<compile_context>
chip_gen: v7x
topology: tpu7x:2x2x1
jax: 0.10.0
libtpu: 0.0.40
codegen_flags: <defaults>
</compile_context>

<pallas_src>
import math
import numpy as np
import jax
import jax.numpy as jnp
from jax.experimental import pallas as pl
from jax.experimental.pallas import tpu as pltpu

# ----------------------------- config (small GPT-2-like) --------------------
VOCAB = 64
N_EMBD = 32
N_HEAD = 2
HEAD_DIM = N_EMBD // N_HEAD
N_LAYER = 2
SEQ = 8
BATCH = 2
MLP = 4 * N_EMBD
EPS = 1e-5
VPAD = 128          # lane-dense padded vocab for the LM-head output


# ----------------------------- shared math helpers ---------------------------
def _layernorm(x, g, b):
    mu = jnp.mean(x, axis=-1, keepdims=True)
    var = jnp.mean((x - mu) ** 2, axis=-1, keepdims=True)
    return (x - mu) * jax.lax.rsqrt(var + EPS) * g + b


def _gelu_new(x):
    # GPT-2 uses the tanh-approximate GELU ("gelu_new").
    return 0.5 * x * (1.0 + jnp.tanh(math.sqrt(2.0 / math.pi) * (x + 0.044715 * x ** 3)))


# ----------------------------- fused Pallas kernel ---------------------------
def gpt2_kernel(x_ref, ln1g_ref, ln1b_ref, wqkv_ref, bqkv_ref,
                wproj_ref, bproj_ref, ln2g_ref, ln2b_ref,
                wfc_ref, bfc_ref, wfc2_ref, bfc2_ref,
                lnfg_ref, lnfb_ref, wte_p_ref, out_ref):
    """All N_LAYER transformer blocks + final LN + tied LM head, whole batch."""
    B, T, C = x_ref.shape
    BT = B * T

    # residual stream, f32, VMEM-resident for the whole forward pass
    x = x_ref[...].reshape(BT, C)

    row = jax.lax.broadcasted_iota(jnp.int32, (T, T), 0)
    col = jax.lax.broadcasted_iota(jnp.int32, (T, T), 1)
    causal = (row >= col)[None]                     # (1, T, T), broadcasts over batch
    scale = jnp.float32(1.0 / math.sqrt(HEAD_DIM))

    def mm(a, w):                                   # bf16 MXU matmul, f32 accumulate
        return jnp.dot(a.astype(jnp.bfloat16), w, preferred_element_type=jnp.float32)

    for l in range(N_LAYER):                        # static unroll; weights stay resident
        # ---- attention ----
        xn = _layernorm(x, ln1g_ref[l], ln1b_ref[l])
        qkv = mm(xn, wqkv_ref[l]) + bqkv_ref[l]                 # (BT, 3C) f32
        qkv = qkv.reshape(B, T, 3 * C)

        head_outs = []
        for h in range(N_HEAD):
            q = qkv[:, :, h * HEAD_DIM:(h + 1) * HEAD_DIM]                      # (B, T, D)
            k = qkv[:, :, C + h * HEAD_DIM:C + (h + 1) * HEAD_DIM]
            v = qkv[:, :, 2 * C + h * HEAD_DIM:2 * C + (h + 1) * HEAD_DIM]
            att = jnp.einsum('btd,bsd->bts',
                             q.astype(jnp.bfloat16), k.astype(jnp.bfloat16),
                             preferred_element_type=jnp.float32) * scale        # (B, T, T)
            att = jnp.where(causal, att, jnp.float32(-1e9))
            att = att - jnp.max(att, axis=-1, keepdims=True)
            p = jnp.exp(att)
            p = p * pl.reciprocal(jnp.sum(p, axis=-1, keepdims=True), approx=True)
            o_h = jnp.einsum('bts,bsd->btd',
                             p.astype(jnp.bfloat16), v.astype(jnp.bfloat16),
                             preferred_element_type=jnp.float32)                # (B, T, D)
            head_outs.append(o_h.reshape(BT, HEAD_DIM))
        y = jnp.concatenate(head_outs, axis=-1)                 # (BT, C)
        x = x + mm(y, wproj_ref[l]) + bproj_ref[l]

        # ---- MLP ----
        xn2 = _layernorm(x, ln2g_ref[l], ln2b_ref[l])
        h1 = _gelu_new(mm(xn2, wfc_ref[l]) + bfc_ref[l])
        x = x + mm(h1, wfc2_ref[l]) + bfc2_ref[l]

    # ---- final LayerNorm + tied LM head (transposed contraction on the MXU,
    #      lane-dense 128-wide padded-vocab output) ----
    xnf = _layernorm(x, lnfg_ref[...], lnfb_ref[...])
    logits = jnp.einsum('nd,vd->nv', xnf.astype(jnp.bfloat16), wte_p_ref[...],
                        preferred_element_type=jnp.float32)      # (BT, VPAD)
    out_ref[...] = logits.reshape(B, T, VPAD)


# ----------------------------- Pallas wrapper --------------------------------
def _full_spec(shape):
    n = len(shape)
    return pl.BlockSpec(shape, lambda i, n=n: (0,) * n)


def gpt2_forward_pallas(input_ids, params):
    wte, wpe, blocks, lnfg, lnfb = params
    B, T = input_ids.shape

    # embedding gather (glue, stays in plain JAX)
    x = wte[input_ids] + wpe[:T][None, :, :]                     # (B, T, C) f32

    # stack per-layer weights along a leading layer axis
    stacked = [jnp.stack([bp[i] for bp in blocks], axis=0) for i in range(12)]
    (ln1g, ln1b, wqkv, bqkv, wproj, bproj,
     ln2g, ln2b, wfc, bfc, wfc2, bfc2) = stacked

    # bf16 for MXU operands (halves weight bytes); LN params / biases stay f32
    wqkv = wqkv.astype(jnp.bfloat16)
    wproj = wproj.astype(jnp.bfloat16)
    wfc = wfc.astype(jnp.bfloat16)
    wfc2 = wfc2.astype(jnp.bfloat16)

    # tied LM head: pad vocab to 128 lanes, no host-side transpose
    wte_pad = jnp.pad(wte, ((0, VPAD - VOCAB), (0, 0))).astype(jnp.bfloat16)   # (VPAD, C)

    inputs = (x, ln1g, ln1b, wqkv, bqkv, wproj, bproj, ln2g, ln2b,
              wfc, bfc, wfc2, bfc2, lnfg, lnfb, wte_pad)

    logits_pad = pl.pallas_call(
        gpt2_kernel,
        out_shape=jax.ShapeDtypeStruct((B, T, VPAD), jnp.float32),
        grid=(1,),
        in_specs=[_full_spec(a.shape) for a in inputs],
        out_specs=pl.BlockSpec((B, T, VPAD), lambda i: (0, 0, 0)),
        compiler_params=pltpu.CompilerParams(dimension_semantics=("arbitrary",)),
    )(*inputs)
    return logits_pad[:, :, :VOCAB]


# ----------------------------- pure-JAX reference ----------------------------
def gpt2_forward_ref(input_ids, params):
    wte, wpe, blocks, lnfg, lnfb = params
    B, T = input_ids.shape
    C = N_EMBD
    x = wte[input_ids] + wpe[:T][None, :, :]
    scale = 1.0 / math.sqrt(HEAD_DIM)
    causal = jnp.tril(jnp.ones((T, T), dtype=bool))
    for bp in blocks:
        (ln1g, ln1b, wqkv, bqkv, wproj, bproj,
         ln2g, ln2b, wfc, bfc, wfc2, bfc2) = bp
        xn = _layernorm(x, ln1g, ln1b)
        qkv = xn @ wqkv + bqkv
        q = qkv[..., :C].reshape(B, T, N_HEAD, HEAD_DIM)
        k = qkv[..., C:2 * C].reshape(B, T, N_HEAD, HEAD_DIM)
        v = qkv[..., 2 * C:].reshape(B, T, N_HEAD, HEAD_DIM)
        att = jnp.einsum('bthd,bshd->bhts', q, k) * scale
        att = jnp.where(causal[None, None], att, -1e9)
        att = jax.nn.softmax(att, axis=-1)
        y = jnp.einsum('bhts,bshd->bthd', att, v).reshape(B, T, C)
        x = x + (y @ wproj + bproj)
        xn2 = _layernorm(x, ln2g, ln2b)
        x = x + (_gelu_new(xn2 @ wfc + bfc) @ wfc2 + bfc2)
    return _layernorm(x, lnfg, lnfb) @ wte.T


# ----------------------------- deterministic init ----------------------------
def init_params(key):
    def nrm(k, shape, s=0.02):
        return s * jax.random.normal(k, shape, dtype=jnp.float32)

    keys = jax.random.split(key, 2 + 6 * N_LAYER)
    wte = nrm(keys[0], (VOCAB, N_EMBD))
    wpe = nrm(keys[1], (SEQ, N_EMBD), s=0.01)
    blocks = []
    ki = 2
    for _ in range(N_LAYER):
        wqkv = nrm(keys[ki], (N_EMBD, 3 * N_EMBD)); ki += 1
        wproj = nrm(keys[ki], (N_EMBD, N_EMBD)); ki += 1
        wfc = nrm(keys[ki], (N_EMBD, MLP)); ki += 1
        wfc2 = nrm(keys[ki], (MLP, N_EMBD)); ki += 1
        blocks.append((
            jnp.ones((1, N_EMBD), jnp.float32), jnp.zeros((1, N_EMBD), jnp.float32),   # ln1
            wqkv, jnp.zeros((1, 3 * N_EMBD), jnp.float32),
            wproj, jnp.zeros((1, N_EMBD), jnp.float32),
            jnp.ones((1, N_EMBD), jnp.float32), jnp.zeros((1, N_EMBD), jnp.float32),   # ln2
            wfc, jnp.zeros((1, MLP), jnp.float32),
            wfc2, jnp.zeros((1, N_EMBD), jnp.float32),
        ))
        ki += 2  # keep split count aligned
    lnfg = jnp.ones((1, N_EMBD), jnp.float32)
    lnfb = jnp.zeros((1, N_EMBD), jnp.float32)
    return wte, wpe, tuple(blocks), lnfg, lnfb


# ----------------------------- main ------------------------------------------
if __name__ == "__main__":
    key = jax.random.PRNGKey(0)
    k_params, k_ids = jax.random.split(key)
    params = init_params(k_params)
    input_ids = jax.random.randint(k_ids, (BATCH, SEQ), 0, VOCAB, dtype=jnp.int32)

    logits = gpt2_forward_pallas(input_ids, params)
    logits = jax.block_until_ready(logits)

    ref = gpt2_forward_ref(input_ids, params)
    assert logits.shape == (BATCH, SEQ, VOCAB)
    assert np.all(np.isfinite(np.array(logits)))
    assert np.allclose(np.array(logits), np.array(ref), atol=1e-2, rtol=1e-2)

    # TODO(synk): the while-loop / openai.ChatCompletion call / file append in
    # MyGPT2Model.forward are host-side I/O with no Pallas equivalent.
    print("KERNEL_OK")
</pallas_src>

<mosaic_0001>
module attributes {stable_mosaic.version = 11 : i64} {
  func.func @gpt2_kernel(%arg0: i32, %arg1: memref<2x8x32xf32, #tpu.memory_space<vmem>>, %arg2: memref<2x1x32xf32, #tpu.memory_space<vmem>>, %arg3: memref<2x1x32xf32, #tpu.memory_space<vmem>>, %arg4: memref<2x32x96xbf16, #tpu.memory_space<vmem>>, %arg5: memref<2x1x96xf32, #tpu.memory_space<vmem>>, %arg6: memref<2x32x32xbf16, #tpu.memory_space<vmem>>, %arg7: memref<2x1x32xf32, #tpu.memory_space<vmem>>, %arg8: memref<2x1x32xf32, #tpu.memory_space<vmem>>, %arg9: memref<2x1x32xf32, #tpu.memory_space<vmem>>, %arg10: memref<2x32x128xbf16, #tpu.memory_space<vmem>>, %arg11: memref<2x1x128xf32, #tpu.memory_space<vmem>>, %arg12: memref<2x128x32xbf16, #tpu.memory_space<vmem>>, %arg13: memref<2x1x32xf32, #tpu.memory_space<vmem>>, %arg14: memref<1x32xf32, #tpu.memory_space<vmem>>, %arg15: memref<1x32xf32, #tpu.memory_space<vmem>>, %arg16: memref<128x32xbf16, #tpu.memory_space<vmem>>, %arg17: memref<2x8x128xf32, #tpu.memory_space<vmem>>) attributes {dimension_semantics = [#tpu.dimension_semantics<arbitrary>], iteration_bounds = array<i64: 1>, scalar_prefetch = 0 : i64, scratch_operands = 0 : i64, tpu.core_type = #tpu.core_type<tc>, window_params = [{pipeline_mode = #tpu.pipeline_mode<synchronous>, transform_indices = @transform_0, window_bounds = array<i64: 2, 8, 32>}, {pipeline_mode = #tpu.pipeline_mode<synchronous>, transform_indices = @transform_1, window_bounds = array<i64: 2, 1, 32>}, {pipeline_mode = #tpu.pipeline_mode<synchronous>, transform_indices = @transform_2, window_bounds = array<i64: 2, 1, 32>}, {pipeline_mode = #tpu.pipeline_mode<synchronous>, transform_indices = @transform_3, window_bounds = array<i64: 2, 32, 96>}, {pipeline_mode = #tpu.pipeline_mode<synchronous>, transform_indices = @transform_4, window_bounds = array<i64: 2, 1, 96>}, {pipeline_mode = #tpu.pipeline_mode<synchronous>, transform_indices = @transform_5, window_bounds = array<i64: 2, 32, 32>}, {pipeline_mode = #tpu.pipeline_mode<synchronous>, transform_indices = @transform_6, window_bounds = array<i64: 2, 1, 32>}, {pipeline_mode = #tpu.pipeline_mode<synchronous>, transform_indices = @transform_7, window_bounds = array<i64: 2, 1, 32>}, {pipeline_mode = #tpu.pipeline_mode<synchronous>, transform_indices = @transform_8, window_bounds = array<i64: 2, 1, 32>}, {pipeline_mode = #tpu.pipeline_mode<synchronous>, transform_indices = @transform_9, window_bounds = array<i64: 2, 32, 128>}, {pipeline_mode = #tpu.pipeline_mode<synchronous>, transform_indices = @transform_10, window_bounds = array<i64: 2, 1, 128>}, {pipeline_mode = #tpu.pipeline_mode<synchronous>, transform_indices = @transform_11, window_bounds = array<i64: 2, 128, 32>}, {pipeline_mode = #tpu.pipeline_mode<synchronous>, transform_indices = @transform_12, window_bounds = array<i64: 2, 1, 32>}, {pipeline_mode = #tpu.pipeline_mode<synchronous>, transform_indices = @transform_13, window_bounds = array<i64: 1, 32>}, {pipeline_mode = #tpu.pipeline_mode<synchronous>, transform_indices = @transform_14, window_bounds = array<i64: 1, 32>}, {pipeline_mode = #tpu.pipeline_mode<synchronous>, transform_indices = @transform_15, window_bounds = array<i64: 128, 32>}, {pipeline_mode = #tpu.pipeline_mode<synchronous>, transform_indices = @transform_16, window_bounds = array<i64: 2, 8, 128>}]} {
    %c0 = arith.constant 0 : index
    %c0_0 = arith.constant 0 : index
    %c0_1 = arith.constant 0 : index
    %0 = vector.load %arg1[%c0, %c0_0, %c0_1] : memref<2x8x32xf32, #tpu.memory_space<vmem>>, vector<2x8x32xf32>
    %1 = vector.shape_cast %0 : vector<2x8x32xf32> to vector<16x32xf32>
    %2 = tpu.iota {dimensions = array<i32: 0>} : vector<8x8xi32>
    %3 = tpu.iota {dimensions = array<i32: 1>} : vector<8x8xi32>
    %4 = arith.cmpi sge, %2, %3 : vector<8x8xi32>
    %5 = vector.shape_cast %4 : vector<8x8xi1> to vector<1x8x8xi1>
    %c0_2 = arith.constant 0 : index
    %c0_3 = arith.constant 0 : index
    %c0_4 = arith.constant 0 : index
    %6 = vector.load %arg2[%c0_2, %c0_3, %c0_4] : memref<2x1x32xf32, #tpu.memory_space<vmem>>, vector<1x1x32xf32>
    %7 = vector.shape_cast %6 : vector<1x1x32xf32> to vector<1x32xf32>
    %c0_5 = arith.constant 0 : index
    %c0_6 = arith.constant 0 : index
    %c0_7 = arith.constant 0 : index
    %8 = vector.load %arg3[%c0_5, %c0_6, %c0_7] : memref<2x1x32xf32, #tpu.memory_space<vmem>>, vector<1x1x32xf32>
    %9 = vector.shape_cast %8 : vector<1x1x32xf32> to vector<1x32xf32>
    %cst = arith.constant dense<0.000000e+00> : vector<16xf32>
    %10 = vector.multi_reduction <add>, %1, %cst [1] : vector<16x32xf32> to vector<16xf32>
    %11 = vector.shape_cast %10 : vector<16xf32> to vector<16x1xf32>
    %cst_8 = arith.constant 3.200000e+01 : f32
    %12 = vector.broadcast %cst_8 : f32 to vector<16x1xf32>
    %13 = arith.divf %11, %12 : vector<16x1xf32>
    %14 = vector.broadcast %13 : vector<16x1xf32> to vector<16x32xf32>
    %15 = arith.subf %1, %14 : vector<16x32xf32>
    %16 = arith.mulf %15, %15 : vector<16x32xf32>
    %cst_9 = arith.constant dense<0.000000e+00> : vector<16xf32>
    %17 = vector.multi_reduction <add>, %16, %cst_9 [1] : vector<16x32xf32> to vector<16xf32>
    %18 = vector.shape_cast %17 : vector<16xf32> to vector<16x1xf32>
    %cst_10 = arith.constant 3.200000e+01 : f32
    %19 = vector.broadcast %cst_10 : f32 to vector<16x1xf32>
    %20 = arith.divf %18, %19 : vector<16x1xf32>
    %21 = vector.broadcast %13 : vector<16x1xf32> to vector<16x32xf32>
    %22 = arith.subf %1, %21 : vector<16x32xf32>
    %cst_11 = arith.constant 9.99999974E-6 : f32
    %23 = vector.broadcast %cst_11 : f32 to vector<16x1xf32>
    %24 = arith.addf %20, %23 : vector<16x1xf32>
    %25 = math.rsqrt %24 : vector<16x1xf32>
    %26 = vector.broadcast %25 : vector<16x1xf32> to vector<16x32xf32>
    %27 = arith.mulf %22, %26 : vector<16x32xf32>
    %28 = vector.broadcast %7 : vector<1x32xf32> to vector<16x32xf32>
    %29 = arith.mulf %27, %28 : vector<16x32xf32>
    %30 = vector.broadcast %9 : vector<1x32xf32> to vector<16x32xf32>
    %31 = arith.addf %29, %30 : vector<16x32xf32>
    %c0_12 = arith.constant 0 : index
    %c0_13 = arith.constant 0 : index
    %c0_14 = arith.constant 0 : index
    %32 = vector.load %arg4[%c0_12, %c0_13, %c0_14] : memref<2x32x96xbf16, #tpu.memory_space<vmem>>, vector<1x32x96xbf16>
    %33 = vector.shape_cast %32 : vector<1x32x96xbf16> to vector<32x96xbf16>
    %34 = arith.truncf %31 : vector<16x32xf32> to vector<16x32xbf16>
    %cst_15 = arith.constant dense<0.000000e+00> : vector<16x96xf32>
    %35 = tpu.matmul %34, %33, %cst_15 {dimension_numbers = #tpu.dot_dimension_numbers<[1], [0], [0], [1], [0, 0, 1, 1], [], []>} : vector<16x32xbf16>, vector<32x96xbf16>, vector<16x96xf32> -> vector<16x96xf32>
    %c0_16 = arith.constant 0 : index
    %c0_17 = arith.constant 0 : index
    %c0_18 = arith.constant 0 : index
    %36 = vector.load %arg5[%c0_16, %c0_17, %c0_18] : memref<2x1x96xf32, #tpu.memory_space<vmem>>, vector<1x1x96xf32>
    %37 = vector.shape_cast %36 : vector<1x1x96xf32> to vector<1x96xf32>
    %38 = vector.broadcast %37 : vector<1x96xf32> to vector<16x96xf32>
    %39 = arith.addf %35, %38 : vector<16x96xf32>
    %40 = vector.shape_cast %39 : vector<16x96xf32> to vector<2x8x96xf32>
    %41 = vector.extract_strided_slice %40 {offsets = [0, 0, 0], sizes = [2, 8, 16], strides = [1, 1, 1]} : vector<2x8x96xf32> to vector<2x8x16xf32>
    %42 = vector.extract_strided_slice %40 {offsets = [0, 0, 32], sizes = [2, 8, 16], strides = [1, 1, 1]} : vector<2x8x96xf32> to vector<2x8x16xf32>
    %43 = vector.extract_strided_slice %40 {offsets = [0, 0, 64], sizes = [2, 8, 16], strides = [1, 1, 1]} : vector<2x8x96xf32> to vector<2x8x16xf32>
    %44 = arith.truncf %41 : vector<2x8x16xf32> to vector<2x8x16xbf16>
    %45 = arith.truncf %42 : vector<2x8x16xf32> to vector<2x8x16xbf16>
    "tpu.trace_start"() <{level = 10 : i32, message = "btd,bsd->bts"}> : () -> ()
    %cst_19 = arith.constant dense<0.000000e+00> : vector<2x8x8xf32>
    %46 = tpu.matmul %44, %45, %cst_19 {dimension_numbers = #tpu.dot_dimension_numbers<[2], [2], [1], [1], [0, 0, 0, 1, 1, 1], [0], [0]>} : vector<2x8x16xbf16>, vector<2x8x16xbf16>, vector<2x8x8xf32> -> vector<2x8x8xf32>
    "tpu.trace_stop"() : () -> ()
    %cst_20 = arith.constant 2.500000e-01 : f32
    %47 = vector.broadcast %cst_20 : f32 to vector<2x8x8xf32>
    %48 = arith.mulf %46, %47 : vector<2x8x8xf32>
    %cst_21 = arith.constant -1.000000e+09 : f32
    %49 = vector.shape_cast %5 : vector<1x8x8xi1> to vector<1x8x8xi1>
    %50 = vector.broadcast %49 : vector<1x8x8xi1> to vector<2x8x8xi1>
    %51 = vector.broadcast %cst_21 : f32 to vector<2x8x8xf32>
    %52 = arith.select %50, %48, %51 : vector<2x8x8xi1>, vector<2x8x8xf32>
    %cst_22 = arith.constant dense<0xFF800000> : vector<2x8xf32>
    %53 = vector.multi_reduction <maximumf>, %52, %cst_22 [2] : vector<2x8x8xf32> to vector<2x8xf32>
    %54 = vector.shape_cast %53 : vector<2x8xf32> to vector<2x8x1xf32>
    %55 = vector.broadcast %54 : vector<2x8x1xf32> to vector<2x8x8xf32>
    %56 = arith.subf %52, %55 : vector<2x8x8xf32>
    %57 = math.exp %56 : vector<2x8x8xf32>
    %cst_23 = arith.constant dense<0.000000e+00> : vector<2x8xf32>
    %58 = vector.multi_reduction <add>, %57, %cst_23 [2] : vector<2x8x8xf32> to vector<2x8xf32>
    %59 = vector.shape_cast %58 : vector<2x8xf32> to vector<2x8x1xf32>
    %60 = tpu.reciprocal %59 {approx = true} : vector<2x8x1xf32> -> vector<2x8x1xf32>
    %61 = vector.broadcast %60 : vector<2x8x1xf32> to vector<2x8x8xf32>
    %62 = arith.mulf %57, %61 : vector<2x8x8xf32>
    %63 = arith.truncf %62 : vector<2x8x8xf32> to vector<2x8x8xbf16>
    %64 = arith.truncf %43 : vector<2x8x16xf32> to vector<2x8x16xbf16>
    "tpu.trace_start"() <{level = 10 : i32, message = "bts,bsd->btd"}> : () -> ()
    %cst_24 = arith.constant dense<0.000000e+00> : vector<2x8x16xf32>
    %65 = tpu.matmul %63, %64, %cst_24 {dimension_numbers = #tpu.dot_dimension_numbers<[2], [1], [1], [2], [0, 0, 0, 1, 1, 2], [0], [0]>} : vector<2x8x8xbf16>, vector<2x8x16xbf16>, vector<2x8x16xf32> -> vector<2x8x16xf32>
    "tpu.trace_stop"() : () -> ()
    %66 = vector.shape_cast %65 : vector<2x8x16xf32> to vector<16x16xf32>
    %67 = vector.extract_strided_slice %40 {offsets = [0, 0, 16], sizes = [2, 8, 16], strides = [1, 1, 1]} : vector<2x8x96xf32> to vector<2x8x16xf32>
    %68 = vector.extract_strided_slice %40 {offsets = [0, 0, 48], sizes = [2, 8, 16], strides = [1, 1, 1]} : vector<2x8x96xf32> to vector<2x8x16xf32>
    %69 = vector.extract_strided_slice %40 {offsets = [0, 0, 80], sizes = [2, 8, 16], strides = [1, 1, 1]} : vector<2x8x96xf32> to vector<2x8x16xf32>
    %70 = arith.truncf %67 : vector<2x8x16xf32> to vector<2x8x16xbf16>
    %71 = arith.truncf %68 : vector<2x8x16xf32> to vector<2x8x16xbf16>
    "tpu.trace_start"() <{level = 10 : i32, message = "btd,bsd->bts"}> : () -> ()
    %cst_25 = arith.constant dense<0.000000e+00> : vector<2x8x8xf32>
    %72 = tpu.matmul %70, %71, %cst_25 {dimension_numbers = #tpu.dot_dimension_numbers<[2], [2], [1], [1], [0, 0, 0, 1, 1, 1], [0], [0]>} : vector<2x8x16xbf16>, vector<2x8x16xbf16>, vector<2x8x8xf32> -> vector<2x8x8xf32>
    "tpu.trace_stop"() : () -> ()
    %cst_26 = arith.constant 2.500000e-01 : f32
    %73 = vector.broadcast %cst_26 : f32 to vector<2x8x8xf32>
    %74 = arith.mulf %72, %73 : vector<2x8x8xf32>
    %cst_27 = arith.constant -1.000000e+09 : f32
    %75 = vector.shape_cast %5 : vector<1x8x8xi1> to vector<1x8x8xi1>
    %76 = vector.broadcast %75 : vector<1x8x8xi1> to vector<2x8x8xi1>
    %77 = vector.broadcast %cst_27 : f32 to vector<2x8x8xf32>
    %78 = arith.select %76, %74, %77 : vector<2x8x8xi1>, vector<2x8x8xf32>
    %cst_28 = arith.constant dense<0xFF800000> : vector<2x8xf32>
    %79 = vector.multi_reduction <maximumf>, %78, %cst_28 [2] : vector<2x8x8xf32> to vector<2x8xf32>
    %80 = vector.shape_cast %79 : vector<2x8xf32> to vector<2x8x1xf32>
    %81 = vector.broadcast %80 : vector<2x8x1xf32> to vector<2x8x8xf32>
    %82 = arith.subf %78, %81 : vector<2x8x8xf32>
    %83 = math.exp %82 : vector<2x8x8xf32>
    %cst_29 = arith.constant dense<0.000000e+00> : vector<2x8xf32>
    %84 = vector.multi_reduction <add>, %83, %cst_29 [2] : vector<2x8x8xf32> to vector<2x8xf32>
    %85 = vector.shape_cast %84 : vector<2x8xf32> to vector<2x8x1xf32>
    %86 = tpu.reciprocal %85 {approx = true} : vector<2x8x1xf32> -> vector<2x8x1xf32>
    %87 = vector.broadcast %86 : vector<2x8x1xf32> to vector<2x8x8xf32>
    %88 = arith.mulf %83, %87 : vector<2x8x8xf32>
    %89 = arith.truncf %88 : vector<2x8x8xf32> to vector<2x8x8xbf16>
    %90 = arith.truncf %69 : vector<2x8x16xf32> to vector<2x8x16xbf16>
    "tpu.trace_start"() <{level = 10 : i32, message = "bts,bsd->btd"}> : () -> ()
    %cst_30 = arith.constant dense<0.000000e+00> : vector<2x8x16xf32>
    %91 = tpu.matmul %89, %90, %cst_30 {dimension_numbers = #tpu.dot_dimension_numbers<[2], [1], [1], [2], [0, 0, 0, 1, 1, 2], [0], [0]>} : vector<2x8x8xbf16>, vector<2x8x16xbf16>, vector<2x8x16xf32> -> vector<2x8x16xf32>
    "tpu.trace_stop"() : () -> ()
    %92 = vector.shape_cast %91 : vector<2x8x16xf32> to vector<16x16xf32>
    %93 = tpu.concatenate %66, %92 in 1 : vector<16x16xf32>, vector<16x16xf32> -> vector<16x32xf32>
    %c0_31 = arith.constant 0 : index
    %c0_32 = arith.constant 0 : index
    %c0_33 = arith.constant 0 : index
    %94 = vector.load %arg6[%c0_31, %c0_32, %c0_33] : memref<2x32x32xbf16, #tpu.memory_space<vmem>>, vector<1x32x32xbf16>
    %95 = vector.shape_cast %94 : vector<1x32x32xbf16> to vector<32x32xbf16>
    %96 = arith.truncf %93 : vector<16x32xf32> to vector<16x32xbf16>
    %cst_34 = arith.constant dense<0.000000e+00> : vector<16x32xf32>
    %97 = tpu.matmul %96, %95, %cst_34 {dimension_numbers = #tpu.dot_dimension_numbers<[1], [0], [0], [1], [0, 0, 1, 1], [], []>} : vector<16x32xbf16>, vector<32x32xbf16>, vector<16x32xf32> -> vector<16x32xf32>
    %98 = arith.addf %1, %97 : vector<16x32xf32>
    %c0_35 = arith.constant 0 : index
    %c0_36 = arith.constant 0 : index
    %c0_37 = arith.constant 0 : index
    %99 = vector.load %arg7[%c0_35, %c0_36, %c0_37] : memref<2x1x32xf32, #tpu.memory_space<vmem>>, vector<1x1x32xf32>
    %100 = vector.shape_cast %99 : vector<1x1x32xf32> to vector<1x32xf32>
    %101 = vector.broadcast %100 : vector<1x32xf32> to vector<16x32xf32>
    %102 = arith.addf %98, %101 : vector<16x32xf32>
    %c0_38 = arith.constant 0 : index
    %c0_39 = arith.constant 0 : index
    %c0_40 = arith.constant 0 : index
    %103 = vector.load %arg8[%c0_38, %c0_39, %c0_40] : memref<2x1x32xf32, #tpu.memory_space<vmem>>, vector<1x1x32xf32>
    %104 = vector.shape_cast %103 : vector<1x1x32xf32> to vector<1x32xf32>
    %c0_41 = arith.constant 0 : index
    %c0_42 = arith.constant 0 : index
    %c0_43 = arith.constant 0 : index
    %105 = vector.load %arg9[%c0_41, %c0_42, %c0_43] : memref<2x1x32xf32, #tpu.memory_space<vmem>>, vector<1x1x32xf32>
    %106 = vector.shape_cast %105 : vector<1x1x32xf32> to vector<1x32xf32>
    %cst_44 = arith.constant dense<0.000000e+00> : vector<16xf32>
    %107 = vector.multi_reduction <add>, %102, %cst_44 [1] : vector<16x32xf32> to vector<16xf32>
    %108 = vector.shape_cast %107 : vector<16xf32> to vector<16x1xf32>
    %cst_45 = arith.constant 3.200000e+01 : f32
    %109 = vector.broadcast %cst_45 : f32 to vector<16x1xf32>
    %110 = arith.divf %108, %109 : vector<16x1xf32>
    %111 = vector.broadcast %110 : vector<16x1xf32> to vector<16x32xf32>
    %112 = arith.subf %102, %111 : vector<16x32xf32>
    %113 = arith.mulf %112, %112 : vector<16x32xf32>
    %cst_46 = arith.constant dense<0.000000e+00> : vector<16xf32>
    %114 = vector.multi_reduction <add>, %113, %cst_46 [1] : vector<16x32xf32> to vector<16xf32>
    %115 = vector.shape_cast %114 : vector<16xf32> to vector<16x1xf32>
    %cst_47 = arith.constant 3.200000e+01 : f32
    %116 = vector.broadcast %cst_47 : f32 to vector<16x1xf32>
    %117 = arith.divf %115, %116 : vector<16x1xf32>
    %118 = vector.broadcast %110 : vector<16x1xf32> to vector<16x32xf32>
    %119 = arith.subf %102, %118 : vector<16x32xf32>
    %cst_48 = arith.constant 9.99999974E-6 : f32
    %120 = vector.broadcast %cst_48 : f32 to vector<16x1xf32>
    %121 = arith.addf %117, %120 : vector<16x1xf32>
    %122 = math.rsqrt %121 : vector<16x1xf32>
    %123 = vector.broadcast %122 : vector<16x1xf32> to vector<16x32xf32>
    %124 = arith.mulf %119, %123 : vector<16x32xf32>
    %125 = vector.broadcast %104 : vector<1x32xf32> to vector<16x32xf32>
    %126 = arith.mulf %124, %125 : vector<16x32xf32>
    %127 = vector.broadcast %106 : vector<1x32xf32> to vector<16x32xf32>
    %128 = arith.addf %126, %127 : vector<16x32xf32>
    %c0_49 = arith.constant 0 : index
    %c0_50 = arith.constant 0 : index
    %c0_51 = arith.constant 0 : index
    %129 = vector.load %arg10[%c0_49, %c0_50, %c0_51] : memref<2x32x128xbf16, #tpu.memory_space<vmem>>, vector<1x32x128xbf16>
    %130 = vector.shape_cast %129 : vector<1x32x128xbf16> to vector<32x128xbf16>
    %131 = arith.truncf %128 : vector<16x32xf32> to vector<16x32xbf16>
    %cst_52 = arith.constant dense<0.000000e+00> : vector<16x128xf32>
    %132 = tpu.matmul %131, %130, %cst_52 {dimension_numbers = #tpu.dot_dimension_numbers<[1], [0], [0], [1], [0, 0, 1, 1], [], []>} : vector<16x32xbf16>, vector<32x128xbf16>, vector<16x128xf32> -> vector<16x128xf32>
    %c0_53 = arith.constant 0 : index
    %c0_54 = arith.constant 0 : index
    %c0_55 = arith.constant 0 : index
    %133 = vector.load %arg11[%c0_53, %c0_54, %c0_55] : memref<2x1x128xf32, #tpu.memory_space<vmem>>, vector<1x1x128xf32>
    %134 = vector.shape_cast %133 : vector<1x1x128xf32> to vector<1x128xf32>
    %135 = vector.broadcast %134 : vector<1x128xf32> to vector<16x128xf32>
    %136 = arith.addf %132, %135 : vector<16x128xf32>
    %cst_56 = arith.constant 5.000000e-01 : f32
    %137 = vector.broadcast %cst_56 : f32 to vector<16x128xf32>
    %138 = arith.mulf %137, %136 : vector<16x128xf32>
    %139 = arith.mulf %136, %136 : vector<16x128xf32>
    %140 = arith.mulf %136, %139 : vector<16x128xf32>
    %cst_57 = arith.constant 4.471500e-02 : f32
    %141 = vector.broadcast %cst_57 : f32 to vector<16x128xf32>
    %142 = arith.mulf %141, %140 : vector<16x128xf32>
    %143 = arith.addf %136, %142 : vector<16x128xf32>
    %cst_58 = arith.constant 0.797884583 : f32
    %144 = vector.broadcast %cst_58 : f32 to vector<16x128xf32>
    %145 = arith.mulf %144, %143 : vector<16x128xf32>
    %146 = math.tanh %145 : vector<16x128xf32>
    %cst_59 = arith.constant 1.000000e+00 : f32
    %147 = vector.broadcast %cst_59 : f32 to vector<16x128xf32>
    %148 = arith.addf %147, %146 : vector<16x128xf32>
    %149 = arith.mulf %138, %148 : vector<16x128xf32>
    %c0_60 = arith.constant 0 : index
    %c0_61 = arith.constant 0 : index
    %c0_62 = arith.constant 0 : index
    %150 = vector.load %arg12[%c0_60, %c0_61, %c0_62] : memref<2x128x32xbf16, #tpu.memory_space<vmem>>, vector<1x128x32xbf16>
    %151 = vector.shape_cast %150 : vector<1x128x32xbf16> to vector<128x32xbf16>
    %152 = arith.truncf %149 : vector<16x128xf32> to vector<16x128xbf16>
    %cst_63 = arith.constant dense<0.000000e+00> : vector<16x32xf32>
    %153 = tpu.matmul %152, %151, %cst_63 {dimension_numbers = #tpu.dot_dimension_numbers<[1], [0], [0], [1], [0, 0, 1, 1], [], []>} : vector<16x128xbf16>, vector<128x32xbf16>, vector<16x32xf32> -> vector<16x32xf32>
    %154 = arith.addf %102, %153 : vector<16x32xf32>
    %c0_64 = arith.constant 0 : index
    %c0_65 = arith.constant 0 : index
    %c0_66 = arith.constant 0 : index
    %155 = vector.load %arg13[%c0_64, %c0_65, %c0_66] : memref<2x1x32xf32, #tpu.memory_space<vmem>>, vector<1x1x32xf32>
    %156 = vector.shape_cast %155 : vector<1x1x32xf32> to vector<1x32xf32>
    %157 = vector.broadcast %156 : vector<1x32xf32> to vector<16x32xf32>
    %158 = arith.addf %154, %157 : vector<16x32xf32>
    %c1 = arith.constant 1 : index
    %c0_67 = arith.constant 0 : index
    %c0_68 = arith.constant 0 : index
    %159 = vector.load %arg2[%c1, %c0_67, %c0_68] : memref<2x1x32xf32, #tpu.memory_space<vmem>>, vector<1x1x32xf32>
    %160 = vector.shape_cast %159 : vector<1x1x32xf32> to vector<1x32xf32>
    %c1_69 = arith.constant 1 : index
    %c0_70 = arith.constant 0 : index
    %c0_71 = arith.constant 0 : index
    %161 = vector.load %arg3[%c1_69, %c0_70, %c0_71] : memref<2x1x32xf32, #tpu.memory_space<vmem>>, vector<1x1x32xf32>
    %162 = vector.shape_cast %161 : vector<1x1x32xf32> to vector<1x32xf32>
    %cst_72 = arith.constant dense<0.000000e+00> : vector<16xf32>
    %163 = vector.multi_reduction <add>, %158, %cst_72 [1] : vector<16x32xf32> to vector<16xf32>
    %164 = vector.shape_cast %163 : vector<16xf32> to vector<16x1xf32>
    %cst_73 = arith.constant 3.200000e+01 : f32
    %165 = vector.broadcast %cst_73 : f32 to vector<16x1xf32>
    %166 = arith.divf %164, %165 : vector<16x1xf32>
    %167 = vector.broadcast %166 : vector<16x1xf32> to vector<16x32xf32>
    %168 = arith.subf %158, %167 : vector<16x32xf32>
    %169 = arith.mulf %168, %168 : vector<16x32xf32>
    %cst_74 = arith.constant dense<0.000000e+00> : vector<16xf32>
    %170 = vector.multi_reduction <add>, %169, %cst_74 [1] : vector<16x32xf32> to vector<16xf32>
    %171 = vector.shape_cast %170 : vector<16xf32> to vector<16x1xf32>
    %cst_75 = arith.constant 3.200000e+01 : f32
    %172 = vector.broadcast %cst_75 : f32 to vector<16x1xf32>
    %173 = arith.divf %171, %172 : vector<16x1xf32>
    %174 = vector.broadcast %166 : vector<16x1xf32> to vector<16x32xf32>
    %175 = arith.subf %158, %174 : vector<16x32xf32>
    %cst_76 = arith.constant 9.99999974E-6 : f32
    %176 = vector.broadcast %cst_76 : f32 to vector<16x1xf32>
    %177 = arith.addf %173, %176 : vector<16x1xf32>
    %178 = math.rsqrt %177 : vector<16x1xf32>
    %179 = vector.broadcast %178 : vector<16x1xf32> to vector<16x32xf32>
    %180 = arith.mulf %175, %179 : vector<16x32xf32>
    %181 = vector.broadcast %160 : vector<1x32xf32> to vector<16x32xf32>
    %182 = arith.mulf %180, %181 : vector<16x32xf32>
    %183 = vector.broadcast %162 : vector<1x32xf32> to vector<16x32xf32>
    %184 = arith.addf %182, %183 : vector<16x32xf32>
    %c1_77 = arith.constant 1 : index
    %c0_78 = arith.constant 0 : index
    %c0_79 = arith.constant 0 : index
    %185 = vector.load %arg4[%c1_77, %c0_78, %c0_79] : memref<2x32x96xbf16, #tpu.memory_space<vmem>>, vector<1x32x96xbf16>
    %186 = vector.shape_cast %185 : vector<1x32x96xbf16> to vector<32x96xbf16>
    %187 = arith.truncf %184 : vector<16x32xf32> to vector<16x32xbf16>
    %cst_80 = arith.constant dense<0.000000e+00> : vector<16x96xf32>
    %188 = tpu.matmul %187, %186, %cst_80 {dimension_numbers = #tpu.dot_dimension_numbers<[1], [0], [0], [1], [0, 0, 1, 1], [], []>} : vector<16x32xbf16>, vector<32x96xbf16>, vector<16x96xf32> -> vector<16x96xf32>
    %c1_81 = arith.constant 1 : index
    %c0_82 = arith.constant 0 : index
    %c0_83 = arith.constant 0 : index
    %189 = vector.load %arg5[%c1_81, %c0_82, %c0_83] : memref<2x1x96xf32, #tpu.memory_space<vmem>>, vector<1x1x96xf32>
    %190 = vector.shape_cast %189 : vector<1x1x96xf32> to vector<1x96xf32>
    %191 = vector.broadcast %190 : vector<1x96xf32> to vector<16x96xf32>
    %192 = arith.addf %188, %191 : vector<16x96xf32>
    %193 = vector.shape_cast %192 : vector<16x96xf32> to vector<2x8x96xf32>
    %194 = vector.extract_strided_slice %193 {offsets = [0, 0, 0], sizes = [2, 8, 16], strides = [1, 1, 1]} : vector<2x8x96xf32> to vector<2x8x16xf32>
    %195 = vector.extract_strided_slice %193 {offsets = [0, 0, 32], sizes = [2, 8, 16], strides = [1, 1, 1]} : vector<2x8x96xf32> to vector<2x8x16xf32>
    %196 = vector.extract_strided_slice %193 {offsets = [0, 0, 64], sizes = [2, 8, 16], strides = [1, 1, 1]} : vector<2x8x96xf32> to vector<2x8x16xf32>
    %197 = arith.truncf %194 : vector<2x8x16xf32> to vector<2x8x16xbf16>
    %198 = arith.truncf %195 : vector<2x8x16xf32> to vector<2x8x16xbf16>
    "tpu.trace_start"() <{level = 10 : i32, message = "btd,bsd->bts"}> : () -> ()
    %cst_84 = arith.constant dense<0.000000e+00> : vector<2x8x8xf32>
    %199 = tpu.matmul %197, %198, %cst_84 {dimension_numbers = #tpu.dot_dimension_numbers<[2], [2], [1], [1], [0, 0, 0, 1, 1, 1], [0], [0]>} : vector<2x8x16xbf16>, vector<2x8x16xbf16>, vector<2x8x8xf32> -> vector<2x8x8xf32>
    "tpu.trace_stop"() : () -> ()
    %cst_85 = arith.constant 2.500000e-01 : f32
    %200 = vector.broadcast %cst_85 : f32 to vector<2x8x8xf32>
    %201 = arith.mulf %199, %200 : vector<2x8x8xf32>
    %cst_86 = arith.constant -1.000000e+09 : f32
    %202 = vector.shape_cast %5 : vector<1x8x8xi1> to vector<1x8x8xi1>
    %203 = vector.broadcast %202 : vector<1x8x8xi1> to vector<2x8x8xi1>
    %204 = vector.broadcast %cst_86 : f32 to vector<2x8x8xf32>
    %205 = arith.select %203, %201, %204 : vector<2x8x8xi1>, vector<2x8x8xf32>
    %cst_87 = arith.constant dense<0xFF800000> : vector<2x8xf32>
    %206 = vector.multi_reduction <maximumf>, %205, %cst_87 [2] : vector<2x8x8xf32> to vector<2x8xf32>
    %207 = vector.shape_cast %206 : vector<2x8xf32> to vector<2x8x1xf32>
    %208 = vector.broadcast %207 : vector<2x8x1xf32> to vector<2x8x8xf32>
    %209 = arith.subf %205, %208 : vector<2x8x8xf32>
    %210 = math.exp %209 : vector<2x8x8xf32>
    %cst_88 = arith.constant dense<0.000000e+00> : vector<2x8xf32>
    %211 = vector.multi_reduction <add>, %210, %cst_88 [2] : vector<2x8x8xf32> to vector<2x8xf32>
    %212 = vector.shape_cast %211 : vector<2x8xf32> to vector<2x8x1xf32>
    %213 = tpu.reciprocal %212 {approx = true} : vector<2x8x1xf32> -> vector<2x8x1xf32>
    %214 = vector.broadcast %213 : vector<2x8x1xf32> to vector<2x8x8xf32>
    %215 = arith.mulf %210, %214 : vector<2x8x8xf32>
    %216 = arith.truncf %215 : vector<2x8x8xf32> to vector<2x8x8xbf16>
    %217 = arith.truncf %196 : vector<2x8x16xf32> to vector<2x8x16xbf16>
    "tpu.trace_start"() <{level = 10 : i32, message = "bts,bsd->btd"}> : () -> ()
    %cst_89 = arith.constant dense<0.000000e+00> : vector<2x8x16xf32>
    %218 = tpu.matmul %216, %217, %cst_89 {dimension_numbers = #tpu.dot_dimension_numbers<[2], [1], [1], [2], [0, 0, 0, 1, 1, 2], [0], [0]>} : vector<2x8x8xbf16>, vector<2x8x16xbf16>, vector<2x8x16xf32> -> vector<2x8x16xf32>
    "tpu.trace_stop"() : () -> ()
    %219 = vector.shape_cast %218 : vector<2x8x16xf32> to vector<16x16xf32>
    %220 = vector.extract_strided_slice %193 {offsets = [0, 0, 16], sizes = [2, 8, 16], strides = [1, 1, 1]} : vector<2x8x96xf32> to vector<2x8x16xf32>
    %221 = vector.extract_strided_slice %193 {offsets = [0, 0, 48], sizes = [2, 8, 16], strides = [1, 1, 1]} : vector<2x8x96xf32> to vector<2x8x16xf32>
    %222 = vector.extract_strided_slice %193 {offsets = [0, 0, 80], sizes = [2, 8, 16], strides = [1, 1, 1]} : vector<2x8x96xf32> to vector<2x8x16xf32>
    %223 = arith.truncf %220 : vector<2x8x16xf32> to vector<2x8x16xbf16>
    %224 = arith.truncf %221 : vector<2x8x16xf32> to vector<2x8x16xbf16>
    "tpu.trace_start"() <{level = 10 : i32, message = "btd,bsd->bts"}> : () -> ()
    %cst_90 = arith.constant dense<0.000000e+00> : vector<2x8x8xf32>
    %225 = tpu.matmul %223, %224, %cst_90 {dimension_numbers = #tpu.dot_dimension_numbers<[2], [2], [1], [1], [0, 0, 0, 1, 1, 1], [0], [0]>} : vector<2x8x16xbf16>, vector<2x8x16xbf16>, vector<2x8x8xf32> -> vector<2x8x8xf32>
    "tpu.trace_stop"() : () -> ()
    %cst_91 = arith.constant 2.500000e-01 : f32
    %226 = vector.broadcast %cst_91 : f32 to vector<2x8x8xf32>
    %227 = arith.mulf %225, %226 : vector<2x8x8xf32>
    %cst_92 = arith.constant -1.000000e+09 : f32
    %228 = vector.shape_cast %5 : vector<1x8x8xi1> to vector<1x8x8xi1>
    %229 = vector.broadcast %228 : vector<1x8x8xi1> to vector<2x8x8xi1>
    %230 = vector.broadcast %cst_92 : f32 to vector<2x8x8xf32>
    %231 = arith.select %229, %227, %230 : vector<2x8x8xi1>, vector<2x8x8xf32>
    %cst_93 = arith.constant dense<0xFF800000> : vector<2x8xf32>
    %232 = vector.multi_reduction <maximumf>, %231, %cst_93 [2] : vector<2x8x8xf32> to vector<2x8xf32>
    %233 = vector.shape_cast %232 : vector<2x8xf32> to vector<2x8x1xf32>
    %234 = vector.broadcast %233 : vector<2x8x1xf32> to vector<2x8x8xf32>
    %235 = arith.subf %231, %234 : vector<2x8x8xf32>
    %236 = math.exp %235 : vector<2x8x8xf32>
    %cst_94 = arith.constant dense<0.000000e+00> : vector<2x8xf32>
    %237 = vector.multi_reduction <add>, %236, %cst_94 [2] : vector<2x8x8xf32> to vector<2x8xf32>
    %238 = vector.shape_cast %237 : vector<2x8xf32> to vector<2x8x1xf32>
    %239 = tpu.reciprocal %238 {approx = true} : vector<2x8x1xf32> -> vector<2x8x1xf32>
    %240 = vector.broadcast %239 : vector<2x8x1xf32> to vector<2x8x8xf32>
    %241 = arith.mulf %236, %240 : vector<2x8x8xf32>
    %242 = arith.truncf %241 : vector<2x8x8xf32> to vector<2x8x8xbf16>
    %243 = arith.truncf %222 : vector<2x8x16xf32> to vector<2x8x16xbf16>
    "tpu.trace_start"() <{level = 10 : i32, message = "bts,bsd->btd"}> : () -> ()
    %cst_95 = arith.constant dense<0.000000e+00> : vector<2x8x16xf32>
    %244 = tpu.matmul %242, %243, %cst_95 {dimension_numbers = #tpu.dot_dimension_numbers<[2], [1], [1], [2], [0, 0, 0, 1, 1, 2], [0], [0]>} : vector<2x8x8xbf16>, vector<2x8x16xbf16>, vector<2x8x16xf32> -> vector<2x8x16xf32>
    "tpu.trace_stop"() : () -> ()
    %245 = vector.shape_cast %244 : vector<2x8x16xf32> to vector<16x16xf32>
    %246 = tpu.concatenate %219, %245 in 1 : vector<16x16xf32>, vector<16x16xf32> -> vector<16x32xf32>
    %c1_96 = arith.constant 1 : index
    %c0_97 = arith.constant 0 : index
    %c0_98 = arith.constant 0 : index
    %247 = vector.load %arg6[%c1_96, %c0_97, %c0_98] : memref<2x32x32xbf16, #tpu.memory_space<vmem>>, vector<1x32x32xbf16>
    %248 = vector.shape_cast %247 : vector<1x32x32xbf16> to vector<32x32xbf16>
    %249 = arith.truncf %246 : vector<16x32xf32> to vector<16x32xbf16>
    %cst_99 = arith.constant dense<0.000000e+00> : vector<16x32xf32>
    %250 = tpu.matmul %249, %248, %cst_99 {dimension_numbers = #tpu.dot_dimension_numbers<[1], [0], [0], [1], [0, 0, 1, 1], [], []>} : vector<16x32xbf16>, vector<32x32xbf16>, vector<16x32xf32> -> vector<16x32xf32>
    %251 = arith.addf %158, %250 : vector<16x32xf32>
    %c1_100 = arith.constant 1 : index
    %c0_101 = arith.constant 0 : index
    %c0_102 = arith.constant 0 : index
    %252 = vector.load %arg7[%c1_100, %c0_101, %c0_102] : memref<2x1x32xf32, #tpu.memory_space<vmem>>, vector<1x1x32xf32>
    %253 = vector.shape_cast %252 : vector<1x1x32xf32> to vector<1x32xf32>
    %254 = vector.broadcast %253 : vector<1x32xf32> to vector<16x32xf32>
    %255 = arith.addf %251, %254 : vector<16x32xf32>
    %c1_103 = arith.constant 1 : index
    %c0_104 = arith.constant 0 : index
    %c0_105 = arith.constant 0 : index
    %256 = vector.load %arg8[%c1_103, %c0_104, %c0_105] : memref<2x1x32xf32, #tpu.memory_space<vmem>>, vector<1x1x32xf32>
    %257 = vector.shape_cast %256 : vector<1x1x32xf32> to vector<1x32xf32>
    %c1_106 = arith.constant 1 : index
    %c0_107 = arith.constant 0 : index
    %c0_108 = arith.constant 0 : index
    %258 = vector.load %arg9[%c1_106, %c0_107, %c0_108] : memref<2x1x32xf32, #tpu.memory_space<vmem>>, vector<1x1x32xf32>
    %259 = vector.shape_cast %258 : vector<1x1x32xf32> to vector<1x32xf32>
    %cst_109 = arith.constant dense<0.000000e+00> : vector<16xf32>
    %260 = vector.multi_reduction <add>, %255, %cst_109 [1] : vector<16x32xf32> to vector<16xf32>
    %261 = vector.shape_cast %260 : vector<16xf32> to vector<16x1xf32>
    %cst_110 = arith.constant 3.200000e+01 : f32
    %262 = vector.broadcast %cst_110 : f32 to vector<16x1xf32>
    %263 = arith.divf %261, %262 : vector<16x1xf32>
    %264 = vector.broadcast %263 : vector<16x1xf32> to vector<16x32xf32>
    %265 = arith.subf %255, %264 : vector<16x32xf32>
    %266 = arith.mulf %265, %265 : vector<16x32xf32>
    %cst_111 = arith.constant dense<0.000000e+00> : vector<16xf32>
    %267 = vector.multi_reduction <add>, %266, %cst_111 [1] : vector<16x32xf32> to vector<16xf32>
    %268 = vector.shape_cast %267 : vector<16xf32> to vector<16x1xf32>
    %cst_112 = arith.constant 3.200000e+01 : f32
    %269 = vector.broadcast %cst_112 : f32 to vector<16x1xf32>
    %270 = arith.divf %268, %269 : vector<16x1xf32>
    %271 = vector.broadcast %263 : vector<16x1xf32> to vector<16x32xf32>
    %272 = arith.subf %255, %271 : vector<16x32xf32>
    %cst_113 = arith.constant 9.99999974E-6 : f32
    %273 = vector.broadcast %cst_113 : f32 to vector<16x1xf32>
    %274 = arith.addf %270, %273 : vector<16x1xf32>
    %275 = math.rsqrt %274 : vector<16x1xf32>
    %276 = vector.broadcast %275 : vector<16x1xf32> to vector<16x32xf32>
    %277 = arith.mulf %272, %276 : vector<16x32xf32>
    %278 = vector.broadcast %257 : vector<1x32xf32> to vector<16x32xf32>
    %279 = arith.mulf %277, %278 : vector<16x32xf32>
    %280 = vector.broadcast %259 : vector<1x32xf32> to vector<16x32xf32>
    %281 = arith.addf %279, %280 : vector<16x32xf32>
    %c1_114 = arith.constant 1 : index
    %c0_115 = arith.constant 0 : index
    %c0_116 = arith.constant 0 : index
    %282 = vector.load %arg10[%c1_114, %c0_115, %c0_116] : memref<2x32x128xbf16, #tpu.memory_space<vmem>>, vector<1x32x128xbf16>
    %283 = vector.shape_cast %282 : vector<1x32x128xbf16> to vector<32x128xbf16>
    %284 = arith.truncf %281 : vector<16x32xf32> to vector<16x32xbf16>
    %cst_117 = arith.constant dense<0.000000e+00> : vector<16x128xf32>
    %285 = tpu.matmul %284, %283, %cst_117 {dimension_numbers = #tpu.dot_dimension_numbers<[1], [0], [0], [1], [0, 0, 1, 1], [], []>} : vector<16x32xbf16>, vector<32x128xbf16>, vector<16x128xf32> -> vector<16x128xf32>
    %c1_118 = arith.constant 1 : index
    %c0_119 = arith.constant 0 : index
    %c0_120 = arith.constant 0 : index
    %286 = vector.load %arg11[%c1_118, %c0_119, %c0_120] : memref<2x1x128xf32, #tpu.memory_space<vmem>>, vector<1x1x128xf32>
    %287 = vector.shape_cast %286 : vector<1x1x128xf32> to vector<1x128xf32>
    %288 = vector.broadcast %287 : vector<1x128xf32> to vector<16x128xf32>
    %289 = arith.addf %285, %288 : vector<16x128xf32>
    %cst_121 = arith.constant 5.000000e-01 : f32
    %290 = vector.broadcast %cst_121 : f32 to vector<16x128xf32>
    %291 = arith.mulf %290, %289 : vector<16x128xf32>
    %292 = arith.mulf %289, %289 : vector<16x128xf32>
    %293 = arith.mulf %289, %292 : vector<16x128xf32>
    %cst_122 = arith.constant 4.471500e-02 : f32
    %294 = vector.broadcast %cst_122 : f32 to vector<16x128xf32>
    %295 = arith.mulf %294, %293 : vector<16x128xf32>
    %296 = arith.addf %289, %295 : vector<16x128xf32>
    %cst_123 = arith.constant 0.797884583 : f32
    %297 = vector.broadcast %cst_123 : f32 to vector<16x128xf32>
    %298 = arith.mulf %297, %296 : vector<16x128xf32>
    %299 = math.tanh %298 : vector<16x128xf32>
    %cst_124 = arith.constant 1.000000e+00 : f32
    %300 = vector.broadcast %cst_124 : f32 to vector<16x128xf32>
    %301 = arith.addf %300, %299 : vector<16x128xf32>
    %302 = arith.mulf %291, %301 : vector<16x128xf32>
    %c1_125 = arith.constant 1 : index
    %c0_126 = arith.constant 0 : index
    %c0_127 = arith.constant 0 : index
    %303 = vector.load %arg12[%c1_125, %c0_126, %c0_127] : memref<2x128x32xbf16, #tpu.memory_space<vmem>>, vector<1x128x32xbf16>
    %304 = vector.shape_cast %303 : vector<1x128x32xbf16> to vector<128x32xbf16>
    %305 = arith.truncf %302 : vector<16x128xf32> to vector<16x128xbf16>
    %cst_128 = arith.constant dense<0.000000e+00> : vector<16x32xf32>
    %306 = tpu.matmul %305, %304, %cst_128 {dimension_numbers = #tpu.dot_dimension_numbers<[1], [0], [0], [1], [0, 0, 1, 1], [], []>} : vector<16x128xbf16>, vector<128x32xbf16>, vector<16x32xf32> -> vector<16x32xf32>
    %307 = arith.addf %255, %306 : vector<16x32xf32>
    %c1_129 = arith.constant 1 : index
    %c0_130 = arith.constant 0 : index
    %c0_131 = arith.constant 0 : index
    %308 = vector.load %arg13[%c1_129, %c0_130, %c0_131] : memref<2x1x32xf32, #tpu.memory_space<vmem>>, vector<1x1x32xf32>
    %309 = vector.shape_cast %308 : vector<1x1x32xf32> to vector<1x32xf32>
    %310 = vector.broadcast %309 : vector<1x32xf32> to vector<16x32xf32>
    %311 = arith.addf %307, %310 : vector<16x32xf32>
    %c0_132 = arith.constant 0 : index
    %c0_133 = arith.constant 0 : index
    %312 = vector.load %arg14[%c0_132, %c0_133] : memref<1x32xf32, #tpu.memory_space<vmem>>, vector<1x32xf32>
    %c0_134 = arith.constant 0 : index
    %c0_135 = arith.constant 0 : index
    %313 = vector.load %arg15[%c0_134, %c0_135] : memref<1x32xf32, #tpu.memory_space<vmem>>, vector<1x32xf32>
    %cst_136 = arith.constant dense<0.000000e+00> : vector<16xf32>
    %314 = vector.multi_reduction <add>, %311, %cst_136 [1] : vector<16x32xf32> to vector<16xf32>
    %315 = vector.shape_cast %314 : vector<16xf32> to vector<16x1xf32>
    %cst_137 = arith.constant 3.200000e+01 : f32
    %316 = vector.broadcast %cst_137 : f32 to vector<16x1xf32>
    %317 = arith.divf %315, %316 : vector<16x1xf32>
    %318 = vector.broadcast %317 : vector<16x1xf32> to vector<16x32xf32>
    %319 = arith.subf %311, %318 : vector<16x32xf32>
    %320 = arith.mulf %319, %319 : vector<16x32xf32>
    %cst_138 = arith.constant dense<0.000000e+00> : vector<16xf32>
    %321 = vector.multi_reduction <add>, %320, %cst_138 [1] : vector<16x32xf32> to vector<16xf32>
    %322 = vector.shape_cast %321 : vector<16xf32> to vector<16x1xf32>
    %cst_139 = arith.constant 3.200000e+01 : f32
    %323 = vector.broadcast %cst_139 : f32 to vector<16x1xf32>
    %324 = arith.divf %322, %323 : vector<16x1xf32>
    %325 = vector.broadcast %317 : vector<16x1xf32> to vector<16x32xf32>
    %326 = arith.subf %311, %325 : vector<16x32xf32>
    %cst_140 = arith.constant 9.99999974E-6 : f32
    %327 = vector.broadcast %cst_140 : f32 to vector<16x1xf32>
    %328 = arith.addf %324, %327 : vector<16x1xf32>
    %329 = math.rsqrt %328 : vector<16x1xf32>
    %330 = vector.broadcast %329 : vector<16x1xf32> to vector<16x32xf32>
    %331 = arith.mulf %326, %330 : vector<16x32xf32>
    %332 = vector.broadcast %312 : vector<1x32xf32> to vector<16x32xf32>
    %333 = arith.mulf %331, %332 : vector<16x32xf32>
    %334 = vector.broadcast %313 : vector<1x32xf32> to vector<16x32xf32>
    %335 = arith.addf %333, %334 : vector<16x32xf32>
    %336 = arith.truncf %335 : vector<16x32xf32> to vector<16x32xbf16>
    %c0_141 = arith.constant 0 : index
    %c0_142 = arith.constant 0 : index
    %337 = vector.load %arg16[%c0_141, %c0_142] : memref<128x32xbf16, #tpu.memory_space<vmem>>, vector<128x32xbf16>
    "tpu.trace_start"() <{level = 10 : i32, message = "nd,vd->nv"}> : () -> ()
    %cst_143 = arith.constant dense<0.000000e+00> : vector<16x128xf32>
    %338 = tpu.matmul %336, %337, %cst_143 {dimension_numbers = #tpu.dot_dimension_numbers<[1], [1], [0], [0], [0, 0, 1, 0], [], []>} : vector<16x32xbf16>, vector<128x32xbf16>, vector<16x128xf32> -> vector<16x128xf32>
    "tpu.trace_stop"() : () -> ()
    %339 = vector.shape_cast %338 : vector<16x128xf32> to vector<2x8x128xf32>
    %c0_144 = arith.constant 0 : index
    %c0_145 = arith.constant 0 : index
    %c0_146 = arith.constant 0 : index
    %340 = vector.load %arg17[%c0_144, %c0_145, %c0_146] : memref<2x8x128xf32, #tpu.memory_space<vmem>>, vector<2x8x128xf32>
    tpu.vector_store %arg17[%c0_144, %c0_145, %c0_146], %339 {strides = array<i32>} : memref<2x8x128xf32, #tpu.memory_space<vmem>>, vector<2x8x128xf32>,
    return
  }
  func.func @transform_0(%arg0: i32) -> (i32, i32, i32) {
    %c0_i32 = arith.constant 0 : i32
    %c0_i32_0 = arith.constant 0 : i32
    %c0_i32_1 = arith.constant 0 : i32
    %c0_i32_2 = arith.constant 0 : i32
    return %c0_i32, %c0_i32_0, %c0_i32_1 : i32, i32, i32
  }
  func.func @transform_1(%arg0: i32) -> (i32, i32, i32) {
    %c0_i32 = arith.constant 0 : i32
    %c0_i32_0 = arith.constant 0 : i32
    %c0_i32_1 = arith.constant 0 : i32
    %c0_i32_2 = arith.constant 0 : i32
    return %c0_i32, %c0_i32_0, %c0_i32_1 : i32, i32, i32
  }
  func.func @transform_2(%arg0: i32) -> (i32, i32, i32) {
    %c0_i32 = arith.constant 0 : i32
    %c0_i32_0 = arith.constant 0 : i32
    %c0_i32_1 = arith.constant 0 : i32
    %c0_i32_2 = arith.constant 0 : i32
    return %c0_i32, %c0_i32_0, %c0_i32_1 : i32, i32, i32
  }
  func.func @transform_3(%arg0: i32) -> (i32, i32, i32) {
    %c0_i32 = arith.constant 0 : i32
    %c0_i32_0 = arith.constant 0 : i32
    %c0_i32_1 = arith.constant 0 : i32
    %c0_i32_2 = arith.constant 0 : i32
    return %c0_i32, %c0_i32_0, %c0_i32_1 : i32, i32, i32
  }
  func.func @transform_4(%arg0: i32) -> (i32, i32, i32) {
    %c0_i32 = arith.constant 0 : i32
    %c0_i32_0 = arith.constant 0 : i32
    %c0_i32_1 = arith.constant 0 : i32
    %c0_i32_2 = arith.constant 0 : i32
    return %c0_i32, %c0_i32_0, %c0_i32_1 : i32, i32, i32
  }
  func.func @transform_5(%arg0: i32) -> (i32, i32, i32) {
    %c0_i32 = arith.constant 0 : i32
    %c0_i32_0 = arith.constant 0 : i32
    %c0_i32_1 = arith.constant 0 : i32
    %c0_i32_2 = arith.constant 0 : i32
    return %c0_i32, %c0_i32_0, %c0_i32_1 : i32, i32, i32
  }
  func.func @transform_6(%arg0: i32) -> (i32, i32, i32) {
    %c0_i32 = arith.constant 0 : i32
    %c0_i32_0 = arith.constant 0 : i32
    %c0_i32_1 = arith.constant 0 : i32
    %c0_i32_2 = arith.constant 0 : i32
    return %c0_i32, %c0_i32_0, %c0_i32_1 : i32, i32, i32
  }
  func.func @transform_7(%arg0: i32) -> (i32, i32, i32) {
    %c0_i32 = arith.constant 0 : i32
    %c0_i32_0 = arith.constant 0 : i32
    %c0_i32_1 = arith.constant 0 : i32
    %c0_i32_2 = arith.constant 0 : i32
    return %c0_i32, %c0_i32_0, %c0_i32_1 : i32, i32, i32
  }
  func.func @transform_8(%arg0: i32) -> (i32, i32, i32) {
    %c0_i32 = arith.constant 0 : i32
    %c0_i32_0 = arith.constant 0 : i32
    %c0_i32_1 = arith.constant 0 : i32
    %c0_i32_2 = arith.constant 0 : i32
    return %c0_i32, %c0_i32_0, %c0_i32_1 : i32, i32, i32
  }
  func.func @transform_9(%arg0: i32) -> (i32, i32, i32) {
    %c0_i32 = arith.constant 0 : i32
    %c0_i32_0 = arith.constant 0 : i32
    %c0_i32_1 = arith.constant 0 : i32
    %c0_i32_2 = arith.constant 0 : i32
    return %c0_i32, %c0_i32_0, %c0_i32_1 : i32, i32, i32
  }
  func.func @transform_10(%arg0: i32) -> (i32, i32, i32) {
    %c0_i32 = arith.constant 0 : i32
    %c0_i32_0 = arith.constant 0 : i32
    %c0_i32_1 = arith.constant 0 : i32
    %c0_i32_2 = arith.constant 0 : i32
    return %c0_i32, %c0_i32_0, %c0_i32_1 : i32, i32, i32
  }
  func.func @transform_11(%arg0: i32) -> (i32, i32, i32) {
    %c0_i32 = arith.constant 0 : i32
    %c0_i32_0 = arith.constant 0 : i32
    %c0_i32_1 = arith.constant 0 : i32
    %c0_i32_2 = arith.constant 0 : i32
    return %c0_i32, %c0_i32_0, %c0_i32_1 : i32, i32, i32
  }
  func.func @transform_12(%arg0: i32) -> (i32, i32, i32) {
    %c0_i32 = arith.constant 0 : i32
    %c0_i32_0 = arith.constant 0 : i32
    %c0_i32_1 = arith.constant 0 : i32
    %c0_i32_2 = arith.constant 0 : i32
    return %c0_i32, %c0_i32_0, %c0_i32_1 : i32, i32, i32
  }
  func.func @transform_13(%arg0: i32) -> (i32, i32) {
    %c0_i32 = arith.constant 0 : i32
    %c0_i32_0 = arith.constant 0 : i32
    %c0_i32_1 = arith.constant 0 : i32
    return %c0_i32, %c0_i32_0 : i32, i32
  }
  func.func @transform_14(%arg0: i32) -> (i32, i32) {
    %c0_i32 = arith.constant 0 : i32
    %c0_i32_0 = arith.constant 0 : i32
    %c0_i32_1 = arith.constant 0 : i32
    return %c0_i32, %c0_i32_0 : i32, i32
  }
  func.func @transform_15(%arg0: i32) -> (i32, i32) {
    %c0_i32 = arith.constant 0 : i32
    %c0_i32_0 = arith.constant 0 : i32
    %c0_i32_1 = arith.constant 0 : i32
    return %c0_i32, %c0_i32_0 : i32, i32
  }
  func.func @transform_16(%arg0: i32) -> (i32, i32, i32) {
    %c0_i32 = arith.constant 0 : i32
    %c0_i32_0 = arith.constant 0 : i32
    %c0_i32_1 = arith.constant 0 : i32
    %c0_i32_2 = arith.constant 0 : i32
    return %c0_i32, %c0_i32_0, %c0_i32_1 : i32, i32, i32
  }
}

</mosaic_0001>

<bundles_post_ra>
// kernel: tpu_custom_call.1
= control target key start
LH: loop header
LB: loop body
LE: loop exit
PB: predicated region body
PF: predicated region fallthrough
CT: control target
= control target key end

     0   :  { %s3172_s0 = inlined_call_operand.vmem [shape: f32[2,8,32], index: 0, kind: input, shape index: {}]   ;;  %s3173_s1 = inlined_call_operand.vmem [shape: f32[2,1,32], index: 1, kind: input, shape index: {}]   ;;  %s3174_s2 = inlined_call_operand.vmem [shape: f32[2,1,32], index: 2, kind: input, shape index: {}]   ;;  %s3175_s3 = inlined_call_operand.vmem [shape: bf16[2,32,96], index: 3, kind: input, shape index: {}]   ;;  %s3176_s4 = inlined_call_operand.vmem [shape: f32[2,1,96], index: 4, kind: input, shape index: {}]   ;;  %s3177_s5 = inlined_call_operand.vmem [shape: bf16[2,32,32], index: 5, kind: input, shape index: {}]   ;;  %s3178_s6 = inlined_call_operand.vmem [shape: f32[2,1,32], index: 6, kind: input, shape index: {}]   ;;  %s3179_s7 = inlined_call_operand.vmem [shape: f32[2,1,32], index: 7, kind: input, shape index: {}]   ;;  %s3180_s8 = inlined_call_operand.vmem [shape: f32[2,1,32], index: 8, kind: input, shape index: {}]   ;;  %s3181_s9 = inlined_call_operand.vmem [shape: bf16[2,32,128], index: 9, kind: input, shape index: {}]   ;;  %s3182_s10 = inlined_call_operand.vmem [shape: f32[2,1,128], index: 10, kind: input, shape index: {}]   ;;  %s3183_s11 = inlined_call_operand.vmem [shape: bf16[2,128,32], index: 11, kind: input, shape index: {}]   ;;  %s3184_s12 = inlined_call_operand.vmem [shape: f32[2,1,32], index: 12, kind: input, shape index: {}]   ;;  %s3185_s13 = inlined_call_operand.vmem [shape: f32[1,32], index: 13, kind: input, shape index: {}]   ;;  %s3186_s14 = inlined_call_operand.vmem [shape: f32[1,32], index: 14, kind: input, shape index: {}]   ;;  %s3187_s15 = inlined_call_operand.vmem [shape: bf16[128,32], index: 15, kind: input, shape index: {}]   ;;  %s3188_s16 = inlined_call_operand.hbm [shape: f32[2,8,128], index: 16, kind: output, shape index: {}]  }
   0x1   :  { %3190 = sst [smem:[#allocation5_spill]] %s3172_s0 }
   0x2   :  { %s3191_s23 = sld [smem:[#allocation5_spill]]  ;;  %vm64_vm0 = vcmask 261120  }
   0x8   :  { %v2680_v0 = vld [vmem:[%s3191_s23] sm:$0xff]  ;;  %v2685_v1 = vld [vmem:[%s3191_s23 + $0x8] sm:$0xff] }
   0x9   :  { %v65_v2 = vsel %vm64_vm0, %v2680_v0, 0.0  ;;  %v68_v3 = vsel %vm64_vm0, %v2685_v1, 0.0 }
   0xa   :  { %66 = vadd.xlane.f32.xlu0 %v65_v2 }
   0xe   :  { %69 = vadd.xlane.f32.xlu0 %v68_v3 }
   0xf   :  { %21 = vsyncpa [#allocation3], 0  ;;  %v2461_v14 = vld [vmem:[%s3175_s3] sm:$0xff]   ;;  %v2581_v15 = vmov 0.0   ;;  %v2462_v16 = vld [vmem:[%s3175_s3 + $0x8] sm:$0xff]   ;;  %vm2582_vm1 = vmmov 0   ;;  %v57_v47 = vlaneseq }
  0x10   :  { %2236 = vmatprep.subr.bf16.mxu0 %v2581_v15  ;;  %2268 = vmatprep.subr.bf16.mxu1 %v2581_v15  ;;  %v2046_v25 = vld [vmem:[%s3173_s1] ss:$0 sm:$0xff]  ;;  %s2583_s21 = smov 96   ;;  %vm181_vm2 = vcmask 130048   ;;  %vm283_vm4 = vcmask 64512   ;;  %s2584_s22 = smov 64  }
  0x11   :  { %2237 = vmatpush3.bf16.msra.mxu0 %v2461_v14  ;;  %2240 = vmatprep.mubr.msk.bf16.mxu0 %vm2582_vm1, %v2581_v15  ;;  %v2047_v29 = vld [vmem:[%s3174_s2] ss:$0 sm:$0xff]  ;;  %v58_v48 = vshrl.u32 %v57_v47, 7  ;;  %v60_v49 = vand.u32 127, %v57_v47  ;;  %s2585_s23 = smov 80   ;;  %s2586_s24 = smov 112  }
  0x12   :  { %2238 = vmatprep.subr.bf16.mxu0 %v2581_v15  ;;  %2270 = vmatprep.mubr.msk.bf16.mxu1 %vm2582_vm1, %v2581_v15  ;;  %v2048_v34 = vld [vmem:[%s3176_s4] ss:$0 sm:$0xff]  ;;  %vm313_vm5 = vcmask 1043456   ;;  %s2587_s25 = smov 48   ;;  %s2588_s30 = smov 16  }
  0x13   :  { %vm2741_vm3 = vcmp.ge.s32.totalorder %v58_v48, %v60_v49 }
  0x15   :  { %2239 = vmatpush3.bf16.msra.mxu0 %v2462_v16 }
  0x16   :  { %2244 = vmatprep.subr.bf16.mxu0 %v2581_v15 }
  0x97   :  { %v67_v4 = vpop.xlane.xlu0 %66 }
  0x98   :  { %v72_v5 = vmul.f32 0.03125, %v67_v4 }
  0x9a   :  { %v74_v6 = vsub.f32 %v2680_v0, %v72_v5 }
  0x9b   :  { %v70_v7 = vpop.xlane.xlu0 %69 }
  0x9c   :  { %v73_v8 = vmul.f32 0.03125, %v70_v7  ;;  %v76_v9 = vmul.f32 %v74_v6, %v74_v6 }
  0x9e   :  { %v75_v10 = vsub.f32 %v2685_v1, %v73_v8  ;;  %v78_v11 = vsel %vm64_vm0, %v76_v9, 0.0 }
  0x9f   :  { %79 = vadd.xlane.f32.xlu1 %v78_v11 }
  0xa0   :  { %v77_v12 = vmul.f32 %v75_v10, %v75_v10 }
  0xa2   :  { %v81_v13 = vsel %vm64_vm0, %v77_v12, 0.0 }
  0xa3   :  { %82 = vadd.xlane.f32.xlu1 %v81_v13 }
 0x12c   :  { %v80_v17 = vpop.xlane.xlu1 %79 }
 0x12d   :  { %v84_v18 = vmul.f32 0.03125, %v80_v17 }
 0x12f   :  { %v86_v19 = vadd.f32 1e-05, %v84_v18 }
 0x130   :  { %v83_v20 = vpop.xlane.xlu1 %82 }
 0x131   :  { %2497 = vrsqrt.f32 %v86_v19  ;;  %v85_v21 = vmul.f32 0.03125, %v83_v20 }
 0x133   :  { %v87_v22 = vadd.f32 1e-05, %v85_v21 }
 0x135   :  { %2499 = vrsqrt.f32 %v87_v22 }
 0x13b   :  { %v2498_v23 = vpop.eup %2497 }
 0x13c   :  { %v90_v24 = vmul.f32 %v2498_v23, %v74_v6 }
 0x13e   :  { %v98_v28 = vmul.f32 %v2046_v25, %v90_v24 }
 0x13f   :  { %v2500_v26 = vpop.eup %2499 }
 0x140   :  { %v91_v27 = vmul.f32 %v2500_v26, %v75_v10  ;;  %v106_v31 = vadd.f32 %v2047_v29, %v98_v28 }
 0x142   :  { %v99_v30 = vmul.f32 %v2046_v25, %v91_v27 }
 0x144   :  { %v107_v32 = vadd.f32 %v2047_v29, %v99_v30 }
 0x146   :  { %v112_v33 = vpack.c.bf16 %v107_v32, %v106_v31 }
 0x148   :  { %2241 = vmatmul.mubr.msk.bf16.vlgmr.msra.gmra.mrb[0].mxu0 %vm64_vm0, %v112_v33 }
 0x149   :  { %2246 = vmatprep.mubr.msk.bf16.mxu0 %vm2582_vm1, %v2581_v15 }
 0x21b   :  { %v169_v35 = vpop.f32.mrb[0].mxu0 }
 0x21c   :  { %v170_v36 = vadd.f32 %v2048_v34, %v169_v35  ;;  %v2242_v37 = vpop.f32.mrb[1].mxu0 }
 0x21d   :  { %v172_v38 = vpop.f32.mrb[2].mxu0 }
 0x21e   :  { %v2721_v39 = vpack.c.bf16 %v170_v36, %v170_v36  ;;  %v173_v40 = vadd.f32 %v2048_v34, %v172_v38  ;;  %v2243_v41 = vpop.f32.mrb[3].mxu0 }
 0x220   :  { %v2723_v42 = vpack.c.bf16 %v173_v40, %v173_v40  ;;  %179 = vrot.lane.b32.xlu0 %v2721_v39, %s2583_s21 }
 0x222   :  { %229 = vrot.lane.b32.xlu1 %v2723_v42, %s2583_s21 }
 0x292   :  { %v180_v43 = vpop.permute.xlu0 %179 }
 0x293   :  { %v186_v44 = vsel %vm181_vm2, %v180_v43, 0 }
 0x294   :  { %2245 = vmatpush3.bf16.xpose.msra.mxu0 %v186_v44  ;;  %v230_v45 = vpop.permute.xlu1 %229 }
 0x295   :  { %2250 = vmatprep.subr.bf16.mxu0 %v2581_v15  ;;  %v235_v46 = vsel %vm181_vm2, %v230_v45, 0 }
 0x29b   :  { %2247 = vmatmul.mubr.msk.bf16.vlgmr.msra.gmra.mrb[4].mxu0 %vm181_vm2, %v2721_v39 }
 0x29c   :  { %2251 = vmatpush3.bf16.xpose.msra.mxu0 %v235_v46  ;;  %2252 = vmatprep.mubr.msk.bf16.mxu0 %vm2582_vm1, %v2581_v15 }
 0x29d   :  { %2256 = vmatprep.subr.bf16.mxu0 %v2581_v15 }
 0x2a3   :  { %2253 = vmatmul.mubr.msk.bf16.vlgmr.msra.gmra.mrb[8].mxu0 %vm181_vm2, %v2723_v42 }
 0x2a4   :  { %2258 = vmatprep.mubr.msk.bf16.mxu0 %vm2582_vm1, %v2581_v15 }
 0x36e   :  { %v222_v50 = vpop.f32.mrb[4].mxu0 }
 0x36f   :  { %v277_v52 = vmul.f32 0.25, %v222_v50  ;;  %v2248_v53 = vpop.f32.mrb[5].mxu0 }
 0x370   :  { %v225_v54 = vpop.f32.mrb[6].mxu0 }
 0x371   :  { %v2249_v55 = vpop.f32.mrb[7].mxu0  ;;  %v281_v56 = vsel %vm2741_vm3, %v277_v52, -1e+09 }
 0x372   :  { %v284_v57 = vsel %vm283_vm4, %v281_v56, -inf }
 0x373   :  { %285 = vmax.xlane.f32.xlu1 %v284_v57 }
 0x376   :  { %v271_v58 = vpop.f32.mrb[8].mxu0 }
 0x377   :  { %v278_v59 = vmul.f32 0.25, %v271_v58  ;;  %v2254_v60 = vpop.f32.mrb[9].mxu0 }
 0x378   :  { %v274_v61 = vpop.f32.mrb[10].mxu0 }
 0x379   :  { %v2255_v62 = vpop.f32.mrb[11].mxu0  ;;  %v282_v63 = vsel %vm2741_vm3, %v278_v59, -1e+09 }
 0x37a   :  { %v287_v2 = vsel %vm283_vm4, %v282_v63, -inf }
 0x37b   :  { %288 = vmax.xlane.f32.xlu0 %v287_v2 }
 0x384   :  { %357 = vrot.lane.b32.xlu1 %v2723_v42, %s2584_s22 }
 0x388   :  { %407 = vrot.lane.b32.xlu1 %v2721_v39, %s2585_s23 }
 0x400   :  { %v286_v3 = vpop.xlane.xlu1 %285 }
 0x401   :  { %v290_v4 = vsub.f32 %v281_v56, %v286_v3 }
 0x403   :  { %v292_v5 = vmul.f32 1.442695, %v290_v4 }
 0x404   :  { %v358_v6 = vpop.permute.xlu1 %357 }
 0x405   :  { %2501 = vpow2.f32 %v292_v5  ;;  %v363_v25 = vsel %vm313_vm5, %v358_v6, 0 }
 0x408   :  { %v408_v7 = vpop.permute.xlu1 %407  ;;  %v289_v8 = vpop.xlane.xlu0 %288 }
 0x409   :  { %v291_v9 = vsub.f32 %v282_v63, %v289_v8  ;;  %v413_v10 = vsel %vm181_vm2, %v408_v7, 0 }
 0x40a   :  { %2269 = vmatpush3.bf16.xpose.msra.mxu1 %v413_v10 }
 0x40b   :  { %v294_v11 = vmul.f32 1.442695, %v291_v9  ;;  %2280 = vmatprep.subr.bf16.mxu1 %v2581_v15 }
 0x40d   :  { %2503 = vpow2.f32 %v294_v11 }
 0x40f   :  { %v2502_v12 = vpop.eup %2501 }
 0x410   :  { %v296_v13 = vsel %vm283_vm4, %v2502_v12, 0.0 }
 0x411   :  { %297 = vadd.xlane.f32.xlu0 %v296_v13 }
 0x417   :  { %v2504_v14 = vpop.eup %2503 }
 0x418   :  { %v299_v16 = vsel %vm283_vm4, %v2504_v14, 0.0 }
 0x419   :  { %300 = vadd.xlane.f32.xlu1 %v299_v16  ;;  %v2463_v16 = vld [vmem:[%s3177_s5] sm:$0xff]  }
 0x427   :  { %308 = vrot.lane.b32.xlu0 %v2721_v39, %s2584_s22 }
 0x42a   :  { %457 = vrot.lane.b32.xlu1 %v2723_v42, %s2585_s23 }
 0x42b   :  { %405 = vrot.lane.b32.xlu0 %v2721_v39, %s2586_s24 }
 0x42e   :  { %455 = vrot.lane.b32.xlu1 %v2723_v42, %s2586_s24 }
 0x49e   :  { %v298_v17 = vpop.xlane.xlu0 %297 }
 0x49f   :  { %2505 = vrcp.f32 %v298_v17  ;;  %v2464_v17 = vld [vmem:[%s3177_s5 + $0x8] sm:$0xff]  }
 0x4a2   :  { %v309_v18 = vpop.permute.xlu0 %308 }
 0x4a3   :  { %v315_v19 = vsel %vm313_vm5, %v309_v18, 0 }
 0x4a4   :  { %2257 = vmatpush3.bf16.msra.mxu0 %v315_v19 }
 0x4a5   :  { %2262 = vmatprep.subr.bf16.mxu0 %v2581_v15 }
 0x4a6   :  { %v301_v20 = vpop.xlane.xlu1 %300  ;;  %v406_v21 = vpop.permute.xlu0 %405 }
 0x4a7   :  { %2507 = vrcp.f32 %v301_v20  ;;  %2271 = vmatmul.mubr.msk.bf16.vlgmr.msra.gmra.mrb[0].mxu1 %vm181_vm2, %v406_v21 }
 0x4a8   :  { %2282 = vmatprep.mubr.msk.bf16.mxu1 %vm2582_vm1, %v2581_v15 }
 0x4a9   :  { %v2506_v22 = vpop.eup %2505 }
 0x4aa   :  { %v304_v23 = vmul.f32 %v2506_v22, %v2502_v12  ;;  %v458_v28 = vpop.permute.xlu1 %457 }
 0x4ab   :  { %v463_v30 = vsel %vm181_vm2, %v458_v28, 0 }
 0x4ac   :  { %v306_v24 = vpack.c.bf16 %v304_v23, %v304_v23 }
 0x4ae   :  { %2259 = vmatmul.mubr.msk.bf16.vlgmr.msra.gmra.mrb[12].mxu0 %vm283_vm4, %v306_v24  ;;  %v456_v31 = vpop.permute.xlu1 %455 }
 0x4af   :  { %2263 = vmatpush3.bf16.msra.mxu0 %v363_v25  ;;  %2264 = vmatprep.mubr.msk.bf16.mxu0 %vm2582_vm1, %v2581_v15 }
 0x4b0   :  { %2274 = vmatprep.subr.bf16.mxu0 %v2581_v15 }
 0x4b1   :  { %v2508_v26 = vpop.eup %2507 }
 0x4b2   :  { %v305_v27 = vmul.f32 %v2508_v26, %v2504_v14 }
 0x4b4   :  { %v307_v29 = vpack.c.bf16 %v305_v27, %v305_v27 }
 0x4b6   :  { %2265 = vmatmul.mubr.msk.bf16.vlgmr.msra.gmra.mrb[16].mxu0 %vm283_vm4, %v307_v29 }
 0x4b7   :  { %2276 = vmatprep.mubr.msk.bf16.mxu0 %vm2582_vm1, %v2581_v15 }
 0x4b8   :  { %2275 = vmatpush3.bf16.xpose.msra.mxu0 %v463_v30 }
 0x4b9   :  { %2286 = vmatprep.subr.bf16.mxu0 %v2581_v15 }
 0x4bf   :  { %2277 = vmatmul.mubr.msk.bf16.vlgmr.msra.gmra.mrb[20].mxu0 %vm181_vm2, %v456_v31 }
 0x4c0   :  { %2288 = vmatprep.mubr.msk.bf16.mxu0 %vm2582_vm1, %v2581_v15 }
 0x57a   :  { %v449_v32 = vpop.f32.mrb[0].mxu1 }
 0x57b   :  { %v505_v33 = vmul.f32 0.25, %v449_v32  ;;  %v2272_v34 = vpop.f32.mrb[1].mxu1 }
 0x57c   :  { %v452_v35 = vpop.f32.mrb[2].mxu1  ;;  %v2063_v34 = vld [vmem:[%s3178_s6] ss:$0 sm:$0xff] }
 0x57d   :  { %v2273_v36 = vpop.f32.mrb[3].mxu1  ;;  %v507_v37 = vsel %vm2741_vm3, %v505_v33, -1e+09 }
 0x57e   :  { %v509_v38 = vsel %vm283_vm4, %v507_v37, -inf }
 0x57f   :  { %510 = vmax.xlane.f32.xlu0 %v509_v38 }
 0x581   :  { %v2788_v40 = vpop.f32.mrb[12].mxu0 }
 0x582   :  { %v2260_v41 = vpop.f32.mrb[13].mxu0 }
 0x583   :  { %v354_v43 = vpop.f32.mrb[14].mxu0 }
 0x584   :  { %v2261_v44 = vpop.f32.mrb[15].mxu0 }
 0x589   :  { %v2790_v45 = vpop.f32.mrb[16].mxu0 }
 0x58a   :  { %v2266_v46 = vpop.f32.mrb[17].mxu0 }
 0x58b   :  { %v402_v47 = vpop.f32.mrb[18].mxu0 }
 0x58c   :  { %v2267_v48 = vpop.f32.mrb[19].mxu0 }
 0x592   :  { %v499_v49 = vpop.f32.mrb[20].mxu0 }
 0x593   :  { %v506_v50 = vmul.f32 0.25, %v499_v49  ;;  %v2278_v52 = vpop.f32.mrb[21].mxu0 }
 0x594   :  { %v502_v53 = vpop.f32.mrb[22].mxu0 }
 0x595   :  { %v2279_v54 = vpop.f32.mrb[23].mxu0  ;;  %v508_v55 = vsel %vm2741_vm3, %v506_v50, -1e+09 }
 0x596   :  { %v512_v56 = vsel %vm283_vm4, %v508_v55, -inf }
 0x597   :  { %513 = vmax.xlane.f32.xlu1 %v512_v56  ;;  %v2466_v56 = vld [vmem:[%s3181_s9 + $0x8] sm:$0xff]  }
 0x5a8   :  { %581 = vrot.lane.b32.xlu1 %v2723_v42, %s2587_s25 }
 0x60c   :  { %v511_v57 = vpop.xlane.xlu0 %510 }
 0x60d   :  { %v515_v58 = vsub.f32 %v507_v37, %v511_v57 }
 0x60f   :  { %v517_v59 = vmul.f32 1.442695, %v515_v58 }
 0x611   :  { %2509 = vpow2.f32 %v517_v59 }
 0x61b   :  { %v2510_v60 = vpop.eup %2509 }
 0x61c   :  { %v521_v61 = vsel %vm283_vm4, %v2510_v60, 0.0 }
 0x61d   :  { %522 = vadd.xlane.f32.xlu0 %v521_v61 }
 0x624   :  { %v514_v62 = vpop.xlane.xlu1 %513 }
 0x625   :  { %v516_v63 = vsub.f32 %v508_v55, %v514_v62  ;;  %v2465_v55 = vld [vmem:[%s3181_s9] sm:$0xff]  }
 0x627   :  { %v519_v2 = vmul.f32 1.442695, %v516_v63 }
 0x628   :  { %v582_v3 = vpop.permute.xlu1 %581 }
 0x629   :  { %2511 = vpow2.f32 %v519_v2  ;;  %v587_v4 = vsel %vm313_vm5, %v582_v3, 0  ;;  %v2064_v3 = vld [vmem:[%s3179_s7] ss:$0 sm:$0xff] }
 0x62a   :  { %2287 = vmatpush3.bf16.msra.mxu0 %v587_v4 }
 0x62b   :  { %2300 = vmatprep.subr.bf16.mxu0 %v2581_v15 }
 0x633   :  { %v2512_v5 = vpop.eup %2511 }
 0x634   :  { %v524_v42 = vsel %vm283_vm4, %v2512_v5, 0.0 }
 0x635   :  { %525 = vadd.xlane.f32.xlu0 %v524_v42 }
 0x64b   :  { %533 = vrot.lane.b32.xlu0 %v2721_v39, %s2587_s25 }
 0x6aa   :  { %v523_v6 = vpop.xlane.xlu0 %522 }
 0x6ab   :  { %2513 = vrcp.f32 %v523_v6  ;;  %v2065_v6 = vld [vmem:[%s3180_s8] ss:$0 sm:$0xff] }
 0x6b5   :  { %v2514_v7 = vpop.eup %2513 }
 0x6b6   :  { %v529_v9 = vmul.f32 %v2514_v7, %v2510_v60 }
 0x6b8   :  { %v531_v12 = vpack.c.bf16 %v529_v9, %v529_v9 }
 0x6c2   :  { %v526_v8 = vpop.xlane.xlu0 %525 }
 0x6c3   :  { %2515 = vrcp.f32 %v526_v8 }
 0x6c6   :  { %v534_v10 = vpop.permute.xlu0 %533 }
 0x6c7   :  { %v539_v11 = vsel %vm313_vm5, %v534_v10, 0 }
 0x6c8   :  { %2281 = vmatpush3.bf16.msra.mxu1 %v539_v11  ;;  %v2467_v11 = vld [vmem:[%s3183_s11] sm:$0xff]  }
 0x6c9   :  { %2292 = vmatprep.subr.bf16.mxu1 %v2581_v15 }
 0x6cb   :  { %2283 = vmatmul.mubr.msk.bf16.vlgmr.msra.gmra.mrb[4].mxu1 %vm283_vm4, %v531_v12  ;;  %v2468_v12 = vld [vmem:[%s3183_s11 + $0x8] sm:$0xff]  }
 0x6cc   :  { %2296 = vmatprep.mubr.msk.bf16.mxu1 %vm2582_vm1, %v2581_v15  ;;  %2293 = vmatpush3.bf16.msra.mxu1 %v2463_v16  ;;  %v2472_v16 = vld [vmem:[%s3183_s11 + $0x28] sm:$0xff]  }
 0x6cd   :  { %v2516_v13 = vpop.eup %2515  ;;  %2294 = vmatprep.subr.bf16.mxu1 %v2581_v15 }
 0x6ce   :  { %v530_v39 = vmul.f32 %v2516_v13, %v2512_v5  ;;  %v2469_v13 = vld [vmem:[%s3183_s11 + $0x10] sm:$0xff]  }
 0x6d0   :  { %v532_v14 = vpack.c.bf16 %v530_v39, %v530_v39  ;;  %2295 = vmatpush3.bf16.msra.mxu1 %v2464_v17  ;;  %v2470_v39 = vld [vmem:[%s3183_s11 + $0x18] sm:$0xff]   ;;  %v2473_v17 = vld [vmem:[%s3183_s11 + $0x30] sm:$0xff]  }
 0x6d1   :  { %2308 = vmatprep.subr.bf16.mxu1 %v2581_v15 }
 0x6d2   :  { %2289 = vmatmul.mubr.msk.bf16.vlgmr.msra.gmra.mrb[24].mxu0 %vm283_vm4, %v532_v14  ;;  %v2471_v14 = vld [vmem:[%s3183_s11 + $0x20] sm:$0xff]  }
 0x6d3   :  { %2304 = vmatprep.mubr.msk.bf16.mxu0 %vm2582_vm1, %v2581_v15  ;;  %2301 = vmatpush3.bf16.msra.mxu0 %v2465_v55 }
 0x6d4   :  { %2302 = vmatprep.subr.bf16.mxu0 %v2581_v15 }
 0x6d7   :  { %2303 = vmatpush3.bf16.msra.mxu0 %v2466_v56 }
 0x6d8   :  { %2328 = vmatprep.subr.bf16.mxu0 %v2581_v15 }
 0x79e   :  { %v575_v18 = vpop.f32.mrb[4].mxu1 }
 0x79f   :  { %v2284_v19 = vpop.f32.mrb[5].mxu1 }
 0x7a0   :  { %v578_v20 = vpop.f32.mrb[6].mxu1  ;;  %v2066_v19 = vld [vmem:[%s3182_s10] ss:$0 sm:$0xff] }
 0x7a1   :  { %v2285_v21 = vpop.f32.mrb[7].mxu1 }
 0x7a5   :  { %v623_v22 = vpop.f32.mrb[24].mxu0 }
 0x7a6   :  { %v2451_v23 = vpack.i.bf16 %v623_v22, %v575_v18  ;;  %v2290_v24 = vpop.f32.mrb[25].mxu0  ;;  %v2474_v18 = vld [vmem:[%s3183_s11 + $0x38] sm:$0xff]  }
 0x7a7   :  { %v626_v25 = vpop.f32.mrb[26].mxu0 }
 0x7a8   :  { %2452 = vrot.lane.b32.xlu1 %v2451_v23, %s2588_s30  ;;  %v2291_v26 = vpop.f32.mrb[27].mxu0 }
 0x81a   :  { %v2453_v27 = vpop.permute.xlu1 %2452 }
 0x81b   :  { %v2455_v28 = vunpack.i.h.bf16 %v2453_v27  ;;  %v2454_v29 = vunpack.i.l.bf16 %v2453_v27 }
 0x81d   :  { %v638_v30 = vsel %vm181_vm2, %v2790_v45, %v2455_v28  ;;  %v637_v31 = vsel %vm181_vm2, %v2788_v40, %v2454_v29 }
 0x81e   :  { %v643_v32 = vpack.c.bf16 %v638_v30, %v637_v31 }
 0x820   :  { %2297 = vmatmul.mubr.msk.bf16.vlgmr.msra.gmra.mrb[8].mxu1 %vm64_vm0, %v643_v32 }
 0x821   :  { %2324 = vmatprep.mubr.msk.bf16.mxu1 %vm2582_vm1, %v2581_v15  ;;  %2309 = vmatpush3.bf16.msra.mxu1 %v2467_v11 }
 0x822   :  { %2310 = vmatprep.subr.bf16.mxu1 %v2581_v15 }
 0x825   :  { %2311 = vmatpush3.bf16.msra.mxu1 %v2468_v12 }
 0x826   :  { %2312 = vmatprep.subr.bf16.mxu1 %v2581_v15 }
 0x829   :  { %2313 = vmatpush3.bf16.msra.mxu1 %v2469_v13  ;;  %v2081_v13 = vld [vmem:[%s3173_s1 + $0x1] ss:$0 sm:$0xff] }
 0x82a   :  { %2314 = vmatprep.subr.bf16.mxu1 %v2581_v15 }
 0x82d   :  { %2315 = vmatpush3.bf16.msra.mxu1 %v2470_v39 }
 0x82e   :  { %2316 = vmatprep.subr.bf16.mxu1 %v2581_v15 }
 0x831   :  { %2317 = vmatpush3.bf16.msra.mxu1 %v2471_v14 }
 0x832   :  { %2318 = vmatprep.subr.bf16.mxu1 %v2581_v15 }
 0x835   :  { %2319 = vmatpush3.bf16.msra.mxu1 %v2472_v16 }
 0x836   :  { %2320 = vmatprep.subr.bf16.mxu1 %v2581_v15 }
 0x839   :  { %2321 = vmatpush3.bf16.msra.mxu1 %v2473_v17 }
 0x83a   :  { %2322 = vmatprep.subr.bf16.mxu1 %v2581_v15 }
 0x83d   :  { %2323 = vmatpush3.bf16.msra.mxu1 %v2474_v18  ;;  %v2082_v18 = vld [vmem:[%s3174_s2 + $0x1] ss:$0 sm:$0xff] }
 0x83e   :  { %2354 = vmatprep.subr.bf16.mxu1 %v2581_v15 }
 0x8f3   :  { %v693_v33 = vpop.f32.mrb[8].mxu1 }
 0x8f4   :  { %v700_v35 = vadd.f32 %v693_v33, %v2680_v0  ;;  %v2298_v36 = vpop.f32.mrb[9].mxu1 }
 0x8f5   :  { %v696_v37 = vpop.f32.mrb[10].mxu1 }
 0x8f6   :  { %v2831_v38 = vadd.f32 %v2063_v34, %v700_v35  ;;  %v701_v41 = vadd.f32 %v696_v37, %v2685_v1  ;;  %v2299_v40 = vpop.f32.mrb[11].mxu1 }
 0x8f8   :  { %v2834_v43 = vadd.f32 %v2063_v34, %v701_v41  ;;  %v713_v44 = vsel %vm64_vm0, %v2831_v38, 0.0 }
 0x8f9   :  { %714 = vadd.xlane.f32.xlu1 %v713_v44 }
 0x8fa   :  { %v716_v45 = vsel %vm64_vm0, %v2834_v43, 0.0 }
 0x8fb   :  { %717 = vadd.xlane.f32.xlu0 %v716_v45 }
 0x986   :  { %v715_v46 = vpop.xlane.xlu1 %714 }
 0x987   :  { %v719_v47 = vmul.f32 0.03125, %v715_v46 }
 0x988   :  { %v718_v0 = vpop.xlane.xlu0 %717 }
 0x989   :  { %v721_v48 = vsub.f32 %v2831_v38, %v719_v47  ;;  %v720_v49 = vmul.f32 0.03125, %v718_v0 }
 0x98b   :  { %v722_v50 = vsub.f32 %v2834_v43, %v720_v49  ;;  %v723_v1 = vmul.f32 %v721_v48, %v721_v48  ;;  %v2078_v49 = vld [vmem:[%s3184_s12] ss:$0 sm:$0xff] }
 0x98d   :  { %v725_v52 = vsel %vm64_vm0, %v723_v1, 0.0  ;;  %v724_v53 = vmul.f32 %v722_v50, %v722_v50 }
 0x98e   :  { %726 = vadd.xlane.f32.xlu0 %v725_v52 }
 0x98f   :  { %v728_v54 = vsel %vm64_vm0, %v724_v53, 0.0 }
 0x992   :  { %729 = vadd.xlane.f32.xlu0 %v728_v54 }
 0xa1b   :  { %v727_v57 = vpop.xlane.xlu0 %726 }
 0xa1c   :  { %v731_v58 = vmul.f32 0.03125, %v727_v57 }
 0xa1e   :  { %v733_v59 = vadd.f32 1e-05, %v731_v58 }
 0xa1f   :  { %v730_v60 = vpop.xlane.xlu0 %729 }
 0xa20   :  { %2517 = vrsqrt.f32 %v733_v59  ;;  %v732_v61 = vmul.f32 0.03125, %v730_v60 }
 0xa22   :  { %v734_v62 = vadd.f32 1e-05, %v732_v61 }
 0xa24   :  { %2519 = vrsqrt.f32 %v734_v62 }
 0xa2a   :  { %v2518_v63 = vpop.eup %2517 }
 0xa2b   :  { %v737_v2 = vmul.f32 %v2518_v63, %v721_v48 }
 0xa2d   :  { %v745_v5 = vmul.f32 %v2064_v3, %v737_v2 }
 0xa2e   :  { %v2520_v4 = vpop.eup %2519 }
 0xa2f   :  { %v738_v42 = vmul.f32 %v2520_v4, %v722_v50  ;;  %v753_v8 = vadd.f32 %v2065_v6, %v745_v5  ;;  %v2475_v5 = vld [vmem:[%s3175_s3 + $0x10] sm:$0xff]  }
 0xa31   :  { %v746_v7 = vmul.f32 %v2064_v3, %v738_v42  ;;  %v2476_v42 = vld [vmem:[%s3175_s3 + $0x18] sm:$0xff]  }
 0xa33   :  { %v754_v9 = vadd.f32 %v2065_v6, %v746_v7 }
 0xa35   :  { %v759_v10 = vpack.c.bf16 %v754_v9, %v753_v8 }
 0xa37   :  { %2305 = vmatmul.mubr.msk.bf16.vlgmr.msra.gmra.mrb[28].mxu0 %vm64_vm0, %v759_v10 }
 0xa38   :  { %2332 = vmatprep.mubr.msk.bf16.mxu0 %vm2582_vm1, %v2581_v15  ;;  %2329 = vmatpush3.bf16.msra.mxu0 %v2475_v5 }
 0xa39   :  { %2330 = vmatprep.subr.bf16.mxu0 %v2581_v15 }
 0xa3c   :  { %2331 = vmatpush3.bf16.msra.mxu0 %v2476_v42 }
 0xa3d   :  { %2336 = vmatprep.subr.bf16.mxu0 %v2581_v15 }
 0xb0a   :  { %v816_v20 = vpop.f32.mrb[28].mxu0 }
 0xb0b   :  { %v817_v21 = vadd.f32 %v2066_v19, %v816_v20  ;;  %v2306_v22 = vpop.f32.mrb[29].mxu0 }
 0xb0c   :  { %v819_v23 = vpop.f32.mrb[30].mxu0 }
 0xb0d   :  { %v825_v24 = vmul.f32 %v817_v21, %v817_v21  ;;  %v820_v25 = vadd.f32 %v2066_v19, %v819_v23  ;;  %v2307_v26 = vpop.f32.mrb[31].mxu0  ;;  %v823_v40 = vmul.f32 0.5, %v817_v21  ;;  %v2088_v23 = vld [vmem:[%s3176_s4 + $0x1] ss:$0 sm:$0xff]  ;;  %s2589_s4 = smov [#allocation2]  }
 0xb0f   :  { %v827_v27 = vmul.f32 %v825_v24, %v817_v21  ;;  %v826_v28 = vmul.f32 %v820_v25, %v820_v25  ;;  %v824_v44 = vmul.f32 0.5, %v820_v25 }
 0xb11   :  { %v829_v29 = vmul.f32 0.044715, %v827_v27  ;;  %v828_v30 = vmul.f32 %v826_v28, %v820_v25 }
 0xb13   :  { %v831_v31 = vadd.f32 %v829_v29, %v817_v21  ;;  %v830_v32 = vmul.f32 0.044715, %v828_v30 }
 0xb15   :  { %v833_v33 = vmul.f32 0.7978846, %v831_v31  ;;  %v832_v34 = vadd.f32 %v830_v32, %v820_v25 }
 0xb17   :  { %2521 = vtanh.f32 %v833_v33  ;;  %v834_v35 = vmul.f32 0.7978846, %v832_v34 }
 0xb19   :  { %2523 = vtanh.f32 %v834_v35 }
 0xb21   :  { %v2522_v36 = vpop.eup %2521 }
 0xb22   :  { %v837_v37 = vadd.f32 1.0, %v2522_v36 }
 0xb23   :  { %v2524_v41 = vpop.eup %2523 }
 0xb24   :  { %v838_v45 = vadd.f32 1.0, %v2524_v41  ;;  %v839_v46 = vmul.f32 %v837_v37, %v823_v40 }
 0xb26   :  { %v840_v47 = vmul.f32 %v838_v45, %v824_v44 }
 0xb28   :  { %v857_v0 = vpack.c.bf16 %v840_v47, %v839_v46 }
 0xb2a   :  { %2325 = vmatmul.mubr.bf16.vlgmr.msra.gmra.mrb[12].mxu1 %v857_v0 }
 0xb2b   :  { %2356 = vmatprep.mubr.msk.bf16.mxu1 %vm2582_vm1, %v2581_v15 }
 0xbfd   :  { %v940_v48 = vpop.f32.mrb[12].mxu1 }
 0xbfe   :  { %v947_v50 = vadd.f32 %v940_v48, %v2831_v38  ;;  %v2326_v1 = vpop.f32.mrb[13].mxu1 }
 0xbff   :  { %v943_v52 = vpop.f32.mrb[14].mxu1 }
 0xc00   :  { %v2902_v53 = vadd.f32 %v2078_v49, %v947_v50  ;;  %v948_v54 = vadd.f32 %v943_v52, %v2834_v43  ;;  %v2327_v55 = vpop.f32.mrb[15].mxu1 }
 0xc02   :  { %v2905_v56 = vadd.f32 %v2078_v49, %v948_v54  ;;  %v962_v57 = vsel %vm64_vm0, %v2902_v53, 0.0 }
 0xc03   :  { %963 = vadd.xlane.f32.xlu1 %v962_v57 }
 0xc04   :  { %v965_v58 = vsel %vm64_vm0, %v2905_v56, 0.0 }
 0xc05   :  { %966 = vadd.xlane.f32.xlu0 %v965_v58 }
 0xc90   :  { %v964_v59 = vpop.xlane.xlu1 %963 }
 0xc91   :  { %v968_v60 = vmul.f32 0.03125, %v964_v59 }
 0xc92   :  { %v967_v38 = vpop.xlane.xlu0 %966 }
 0xc93   :  { %v970_v61 = vsub.f32 %v2902_v53, %v968_v60  ;;  %v969_v62 = vmul.f32 0.03125, %v967_v38 }
 0xc95   :  { %v971_v63 = vsub.f32 %v2905_v56, %v969_v62  ;;  %v972_v43 = vmul.f32 %v970_v61, %v970_v61 }
 0xc97   :  { %v974_v2 = vsel %vm64_vm0, %v972_v43, 0.0  ;;  %v973_v3 = vmul.f32 %v971_v63, %v971_v63 }
 0xc98   :  { %975 = vadd.xlane.f32.xlu1 %v974_v2 }
 0xc99   :  { %v977_v4 = vsel %vm64_vm0, %v973_v3, 0.0 }
 0xc9a   :  { %978 = vadd.xlane.f32.xlu0 %v977_v4 }
 0xd25   :  { %v976_v6 = vpop.xlane.xlu1 %975 }
 0xd26   :  { %v980_v7 = vmul.f32 0.03125, %v976_v6 }
 0xd27   :  { %v979_v8 = vpop.xlane.xlu0 %978 }
 0xd28   :  { %v982_v9 = vadd.f32 1e-05, %v980_v7  ;;  %v981_v10 = vmul.f32 0.03125, %v979_v8 }
 0xd2a   :  { %2525 = vrsqrt.f32 %v982_v9  ;;  %v983_v11 = vadd.f32 1e-05, %v981_v10 }
 0xd2c   :  { %2527 = vrsqrt.f32 %v983_v11 }
 0xd34   :  { %v2526_v12 = vpop.eup %2525 }
 0xd35   :  { %v986_v39 = vmul.f32 %v2526_v12, %v970_v61 }
 0xd36   :  { %v2528_v14 = vpop.eup %2527 }
 0xd37   :  { %v994_v16 = vmul.f32 %v2081_v13, %v986_v39  ;;  %v987_v17 = vmul.f32 %v2528_v14, %v971_v63 }
 0xd39   :  { %v995_v19 = vmul.f32 %v2081_v13, %v987_v17  ;;  %v1002_v20 = vadd.f32 %v2082_v18, %v994_v16 }
 0xd3b   :  { %v1003_v21 = vadd.f32 %v2082_v18, %v995_v19 }
 0xd3d   :  { %v1009_v22 = vpack.c.bf16 %v1003_v21, %v1002_v20 }
 0xd3f   :  { %2333 = vmatmul.mubr.msk.bf16.vlgmr.msra.gmra.mrb[32].mxu0 %vm64_vm0, %v1009_v22 }
 0xd40   :  { %2338 = vmatprep.mubr.msk.bf16.mxu0 %vm2582_vm1, %v2581_v15 }
 0xe12   :  { %v1067_v24 = vpop.f32.mrb[32].mxu0 }
 0xe13   :  { %v1068_v25 = vadd.f32 %v2088_v23, %v1067_v24  ;;  %v2334_v26 = vpop.f32.mrb[33].mxu0 }
 0xe14   :  { %v1070_v27 = vpop.f32.mrb[34].mxu0 }
 0xe15   :  { %v2935_v28 = vpack.c.bf16 %v1068_v25, %v1068_v25  ;;  %v1071_v29 = vadd.f32 %v2088_v23, %v1070_v27  ;;  %v2335_v30 = vpop.f32.mrb[35].mxu0 }
 0xe17   :  { %v2937_v31 = vpack.c.bf16 %v1071_v29, %v1071_v29  ;;  %1077 = vrot.lane.b32.xlu1 %v2935_v28, %s2583_s21 }
 0xe19   :  { %1126 = vrot.lane.b32.xlu0 %v2937_v31, %s2583_s21  ;;  %s2035_s21 = sshll.u32 %s2589_s4, 4  ;;  %s2036_s21 = int_to_ptr.vmem [resolvable:$true] %s2035_s21 }
 0xe1a   :  { %p2562_p1 = scmp.lt.s32.totalorder %s2036_s21, %s2036_s21 }
 0xe89   :  { %v1078_v32 = vpop.permute.xlu1 %1077 }
 0xe8a   :  { %v1083_v33 = vsel %vm181_vm2, %v1078_v32, 0 }
 0xe8b   :  { %2337 = vmatpush3.bf16.xpose.msra.mxu0 %v1083_v33  ;;  %v1127_v34 = vpop.permute.xlu0 %1126 }
 0xe8c   :  { %2342 = vmatprep.subr.bf16.mxu0 %v2581_v15  ;;  %v1132_v35 = vsel %vm181_vm2, %v1127_v34, 0 }
 0xe92   :  { %2339 = vmatmul.mubr.msk.bf16.vlgmr.msra.gmra.mrb[36].mxu0 %vm181_vm2, %v2935_v28 }
 0xe93   :  { %2343 = vmatpush3.bf16.xpose.msra.mxu0 %v1132_v35  ;;  %2344 = vmatprep.mubr.msk.bf16.mxu0 %vm2582_vm1, %v2581_v15 }
 0xe94   :  { %2348 = vmatprep.subr.bf16.mxu0 %v2581_v15 }
 0xe9a   :  { %2345 = vmatmul.mubr.msk.bf16.vlgmr.msra.gmra.mrb[40].mxu0 %vm181_vm2, %v2937_v31 }
 0xe9b   :  { %2350 = vmatprep.mubr.msk.bf16.mxu0 %vm2582_vm1, %v2581_v15 }
 0xf65   :  { %v1119_v36 = vpop.f32.mrb[36].mxu0 }
 0xf66   :  { %v1174_v37 = vmul.f32 0.25, %v1119_v36  ;;  %v2340_v41 = vpop.f32.mrb[37].mxu0 }
 0xf67   :  { %v1122_v40 = vpop.f32.mrb[38].mxu0 }
 0xf68   :  { %v2341_v44 = vpop.f32.mrb[39].mxu0  ;;  %v1176_v45 = vsel %vm2741_vm3, %v1174_v37, -1e+09 }
 0xf69   :  { %v1178_v46 = vsel %vm283_vm4, %v1176_v45, -inf }
 0xf6a   :  { %1179 = vmax.xlane.f32.xlu1 %v1178_v46 }
 0xf6d   :  { %v1168_v47 = vpop.f32.mrb[40].mxu0 }
 0xf6e   :  { %v1175_v0 = vmul.f32 0.25, %v1168_v47  ;;  %v2346_v48 = vpop.f32.mrb[41].mxu0 }
 0xf6f   :  { %v1171_v49 = vpop.f32.mrb[42].mxu0 }
 0xf70   :  { %v2347_v50 = vpop.f32.mrb[43].mxu0  ;;  %v1177_v1 = vsel %vm2741_vm3, %v1175_v0, -1e+09 }
 0xf71   :  { %v1181_v52 = vsel %vm283_vm4, %v1177_v1, -inf }
 0xf72   :  { %1182 = vmax.xlane.f32.xlu0 %v1181_v52 }
 0xf7b   :  { %1202 = vrot.lane.b32.xlu1 %v2935_v28, %s2584_s22 }
 0xff7   :  { %v1180_v54 = vpop.xlane.xlu1 %1179 }
 0xff8   :  { %v1184_v55 = vsub.f32 %v1176_v45, %v1180_v54 }
 0xffa   :  { %v1186_v57 = vmul.f32 1.442695, %v1184_v55 }
 0xffb   :  { %v1203_v58 = vpop.permute.xlu1 %1202 }
 0xffc   :  { %2529 = vpow2.f32 %v1186_v57  ;;  %v1208_v59 = vsel %vm313_vm5, %v1203_v58, 0 }
 0xffd   :  { %2349 = vmatpush3.bf16.msra.mxu0 %v1208_v59 }
 0xffe   :  { %2360 = vmatprep.subr.bf16.mxu0 %v2581_v15 }
 0xfff   :  { %v1183_v60 = vpop.xlane.xlu0 %1182 }
0x1000   :  { %v1185_v38 = vsub.f32 %v1177_v1, %v1183_v60 }
0x1002   :  { %v1188_v61 = vmul.f32 1.442695, %v1185_v38 }
0x1004   :  { %2531 = vpow2.f32 %v1188_v61 }
0x1006   :  { %v2530_v62 = vpop.eup %2529 }
0x1007   :  { %v1190_v63 = vsel %vm283_vm4, %v2530_v62, 0.0 }
0x1008   :  { %1191 = vadd.xlane.f32.xlu1 %v1190_v63 }
0x100e   :  { %v2532_v43 = vpop.eup %2531 }
0x100f   :  { %v1193_v2 = vsel %vm283_vm4, %v2532_v43, 0.0 }
0x1010   :  { %1194 = vadd.xlane.f32.xlu0 %v1193_v2  ;;  %v2477_v2 = vld [vmem:[%s3177_s5 + $0x10] sm:$0xff]  }
0x1019   :  { %1300 = vrot.lane.b32.xlu1 %v2935_v28, %s2585_s23 }
0x101d   :  { %1350 = vrot.lane.b32.xlu1 %v2937_v31, %s2585_s23 }
0x1021   :  { %1298 = vrot.lane.b32.xlu1 %v2935_v28, %s2586_s24 }
0x1026   :  { %1250 = vrot.lane.b32.xlu0 %v2937_v31, %s2584_s22 }
0x102a   :  { %1348 = vrot.lane.b32.xlu0 %v2937_v31, %s2586_s24 }
0x1095   :  { %v1192_v3 = vpop.xlane.xlu1 %1191 }
0x1096   :  { %2533 = vrcp.f32 %v1192_v3  ;;  %v2478_v3 = vld [vmem:[%s3177_s5 + $0x18] sm:$0xff]  }
0x1099   :  { %v1301_v42 = vpop.permute.xlu1 %1300 }
0x109a   :  { %v1306_v10 = vsel %vm181_vm2, %v1301_v42, 0 }
0x109d   :  { %v1195_v4 = vpop.xlane.xlu0 %1194  ;;  %v1351_v11 = vpop.permute.xlu1 %1350 }
0x109e   :  { %2535 = vrcp.f32 %v1195_v4  ;;  %v1356_v16 = vsel %vm181_vm2, %v1351_v11, 0 }
0x10a0   :  { %v2534_v5 = vpop.eup %2533 }
0x10a1   :  { %v1198_v6 = vmul.f32 %v2534_v5, %v2530_v62  ;;  %v1251_v7 = vpop.permute.xlu0 %1250  ;;  %v1299_v14 = vpop.permute.xlu1 %1298 }
0x10a2   :  { %v1256_v8 = vsel %vm313_vm5, %v1251_v7, 0 }
0x10a3   :  { %2355 = vmatpush3.bf16.msra.mxu1 %v1256_v8  ;;  %v1200_v9 = vpack.c.bf16 %v1198_v6, %v1198_v6 }
0x10a4   :  { %2366 = vmatprep.subr.bf16.mxu1 %v2581_v15 }
0x10a5   :  { %2351 = vmatmul.mubr.msk.bf16.vlgmr.msra.gmra.mrb[44].mxu0 %vm283_vm4, %v1200_v9  ;;  %v1349_v17 = vpop.permute.xlu0 %1348 }
0x10a6   :  { %2361 = vmatpush3.bf16.xpose.msra.mxu0 %v1306_v10  ;;  %2362 = vmatprep.mubr.msk.bf16.mxu0 %vm2582_vm1, %v2581_v15 }
0x10a7   :  { %2372 = vmatprep.subr.bf16.mxu0 %v2581_v15 }
0x10a8   :  { %v2536_v12 = vpop.eup %2535 }
0x10a9   :  { %v1199_v13 = vmul.f32 %v2536_v12, %v2532_v43 }
0x10ab   :  { %v1201_v39 = vpack.c.bf16 %v1199_v13, %v1199_v13 }
0x10ad   :  { %2357 = vmatmul.mubr.msk.bf16.vlgmr.msra.gmra.mrb[16].mxu1 %vm283_vm4, %v1201_v39  ;;  %2363 = vmatmul.mubr.msk.bf16.vlgmr.msra.gmra.mrb[48].mxu0 %vm181_vm2, %v1299_v14 }
0x10ae   :  { %2367 = vmatpush3.bf16.xpose.msra.mxu1 %v1356_v16  ;;  %2368 = vmatprep.mubr.msk.bf16.mxu1 %vm2582_vm1, %v2581_v15 }
0x10af   :  { %2378 = vmatprep.subr.bf16.mxu1 %v2581_v15  ;;  %2374 = vmatprep.mubr.msk.bf16.mxu0 %vm2582_vm1, %v2581_v15 }
0x10b5   :  { %2369 = vmatmul.mubr.msk.bf16.vlgmr.msra.gmra.mrb[20].mxu1 %vm181_vm2, %v1349_v17 }
0x10b6   :  { %2380 = vmatprep.mubr.msk.bf16.mxu1 %vm2582_vm1, %v2581_v15 }
0x1178   :  { %v2995_v18 = vpop.f32.mrb[44].mxu0 }
0x1179   :  { %v2352_v19 = vpop.f32.mrb[45].mxu0 }
0x117a   :  { %v1247_v20 = vpop.f32.mrb[46].mxu0 }
0x117b   :  { %v2353_v21 = vpop.f32.mrb[47].mxu0  ;;  %v2108_v20 = vld [vmem:[%s3178_s6 + $0x1] ss:$0 sm:$0xff] }
0x1180   :  { %v2997_v22 = vpop.f32.mrb[16].mxu1  ;;  %v1342_v23 = vpop.f32.mrb[48].mxu0 }
0x1181   :  { %v1398_v24 = vmul.f32 0.25, %v1342_v23  ;;  %v2358_v25 = vpop.f32.mrb[17].mxu1  ;;  %v2364_v26 = vpop.f32.mrb[49].mxu0 }
0x1182   :  { %v1295_v27 = vpop.f32.mrb[18].mxu1  ;;  %v1345_v29 = vpop.f32.mrb[50].mxu0 }
0x1183   :  { %v2359_v30 = vpop.f32.mrb[19].mxu1  ;;  %v2365_v32 = vpop.f32.mrb[51].mxu0  ;;  %v1400_v33 = vsel %vm2741_vm3, %v1398_v24, -1e+09 }
0x1184   :  { %v1402_v34 = vsel %vm283_vm4, %v1400_v33, -inf }
0x1185   :  { %1403 = vmax.xlane.f32.xlu1 %v1402_v34 }
0x1188   :  { %v1392_v35 = vpop.f32.mrb[20].mxu1 }
0x1189   :  { %v1399_v36 = vmul.f32 0.25, %v1392_v35  ;;  %v2370_v37 = vpop.f32.mrb[21].mxu1 }
0x118a   :  { %v1395_v41 = vpop.f32.mrb[22].mxu1 }
0x118b   :  { %v2371_v40 = vpop.f32.mrb[23].mxu1  ;;  %v1401_v44 = vsel %vm2741_vm3, %v1399_v36, -1e+09 }
0x118c   :  { %v1405_v45 = vsel %vm283_vm4, %v1401_v44, -inf  ;;  %v2479_v40 = vld [vmem:[%s3181_s9 + $0x10] sm:$0xff]  }
0x118d   :  { %1406 = vmax.xlane.f32.xlu0 %v1405_v45 }
0x1196   :  { %1426 = vrot.lane.b32.xlu1 %v2935_v28, %s2587_s25 }
0x1212   :  { %v1404_v46 = vpop.xlane.xlu1 %1403 }
0x1213   :  { %v1408_v47 = vsub.f32 %v1400_v33, %v1404_v46 }
0x1215   :  { %v1410_v0 = vmul.f32 1.442695, %v1408_v47 }
0x1216   :  { %v1427_v48 = vpop.permute.xlu1 %1426 }
0x1217   :  { %2537 = vpow2.f32 %v1410_v0  ;;  %v1432_v49 = vsel %vm313_vm5, %v1427_v48, 0 }
0x1218   :  { %2373 = vmatpush3.bf16.msra.mxu0 %v1432_v49 }
0x1219   :  { %2384 = vmatprep.subr.bf16.mxu0 %v2581_v15 }
0x121a   :  { %v1407_v50 = vpop.xlane.xlu0 %1406 }
0x121b   :  { %v1409_v1 = vsub.f32 %v1401_v44, %v1407_v50  ;;  %v2480_v44 = vld [vmem:[%s3181_s9 + $0x18] sm:$0xff]  }
0x121d   :  { %v1412_v51 = vmul.f32 1.442695, %v1409_v1  ;;  %v2111_v1 = vld [vmem:[%s3179_s7 + $0x1] ss:$0 sm:$0xff] }
0x121f   :  { %2539 = vpow2.f32 %v1412_v51 }
0x1221   :  { %v2538_v52 = vpop.eup %2537 }
0x1222   :  { %v1414_v54 = vsel %vm283_vm4, %v2538_v52, 0.0 }
0x1223   :  { %1415 = vadd.xlane.f32.xlu0 %v1414_v54 }
0x1229   :  { %v2540_v55 = vpop.eup %2539 }
0x122a   :  { %v1417_v28 = vsel %vm283_vm4, %v2540_v55, 0.0 }
0x122b   :  { %1418 = vadd.xlane.f32.xlu0 %v1417_v28  ;;  %v2112_v28 = vld [vmem:[%s3180_s8 + $0x1] ss:$0 sm:$0xff] }
0x1241   :  { %1474 = vrot.lane.b32.xlu0 %v2937_v31, %s2587_s25 }
0x12b0   :  { %v1416_v57 = vpop.xlane.xlu0 %1415 }
0x12b1   :  { %2541 = vrcp.f32 %v1416_v57 }
0x12b8   :  { %v1419_v58 = vpop.xlane.xlu0 %1418 }
0x12b9   :  { %2543 = vrcp.f32 %v1419_v58 }
0x12bb   :  { %v2542_v59 = vpop.eup %2541 }
0x12bc   :  { %v1422_v60 = vmul.f32 %v2542_v59, %v2538_v52  ;;  %v1475_v38 = vpop.permute.xlu0 %1474 }
0x12bd   :  { %v1480_v61 = vsel %vm313_vm5, %v1475_v38, 0  ;;  %v2481_v38 = vld [vmem:[%s3183_s11 + $0x40] sm:$0xff]  }
0x12be   :  { %2379 = vmatpush3.bf16.msra.mxu1 %v1480_v61  ;;  %v1424_v62 = vpack.c.bf16 %v1422_v60, %v1422_v60  ;;  %v2482_v61 = vld [vmem:[%s3183_s11 + $0x48] sm:$0xff]  }
0x12bf   :  { %2392 = vmatprep.subr.bf16.mxu1 %v2581_v15 }
0x12c0   :  { %2375 = vmatmul.mubr.msk.bf16.vlgmr.msra.gmra.mrb[52].mxu0 %vm283_vm4, %v1424_v62  ;;  %v2483_v62 = vld [vmem:[%s3183_s11 + $0x50] sm:$0xff]  }
0x12c1   :  { %2388 = vmatprep.mubr.msk.bf16.mxu0 %vm2582_vm1, %v2581_v15  ;;  %2385 = vmatpush3.bf16.msra.mxu0 %v2477_v2  ;;  %v2487_v2 = vld [vmem:[%s3183_s11 + $0x70] sm:$0xff]  }
0x12c2   :  { %2386 = vmatprep.subr.bf16.mxu0 %v2581_v15 }
0x12c3   :  { %v2544_v63 = vpop.eup %2543 }
0x12c4   :  { %v1423_v31 = vmul.f32 %v2544_v63, %v2540_v55  ;;  %v2484_v63 = vld [vmem:[%s3183_s11 + $0x58] sm:$0xff]  }
0x12c5   :  { %2387 = vmatpush3.bf16.msra.mxu0 %v2478_v3  ;;  %v2488_v3 = vld [vmem:[%s3183_s11 + $0x78] sm:$0xff]  }
0x12c6   :  { %v1425_v43 = vpack.c.bf16 %v1423_v31, %v1423_v31  ;;  %2400 = vmatprep.subr.bf16.mxu0 %v2581_v15  ;;  %v2485_v31 = vld [vmem:[%s3183_s11 + $0x60] sm:$0xff]  }
0x12c8   :  { %2381 = vmatmul.mubr.msk.bf16.vlgmr.msra.gmra.mrb[24].mxu1 %vm283_vm4, %v1425_v43  ;;  %v2486_v43 = vld [vmem:[%s3183_s11 + $0x68] sm:$0xff]  }
0x12c9   :  { %2396 = vmatprep.mubr.msk.bf16.mxu1 %vm2582_vm1, %v2581_v15  ;;  %2393 = vmatpush3.bf16.msra.mxu1 %v2479_v40 }
0x12ca   :  { %2394 = vmatprep.subr.bf16.mxu1 %v2581_v15 }
0x12cd   :  { %2395 = vmatpush3.bf16.msra.mxu1 %v2480_v44 }
0x12ce   :  { %2420 = vmatprep.subr.bf16.mxu1 %v2581_v15 }
0x1393   :  { %v1468_v4 = vpop.f32.mrb[52].mxu0 }
0x1394   :  { %v2376_v5 = vpop.f32.mrb[53].mxu0 }
0x1395   :  { %v1471_v42 = vpop.f32.mrb[54].mxu0 }
0x1396   :  { %v2377_v6 = vpop.f32.mrb[55].mxu0 }
0x139b   :  { %v1516_v7 = vpop.f32.mrb[24].mxu1 }
0x139c   :  { %v2456_v8 = vpack.i.bf16 %v1516_v7, %v1468_v4  ;;  %v2382_v9 = vpop.f32.mrb[25].mxu1  ;;  %v2118_v4 = vld [vmem:[%s3182_s10 + $0x1] ss:$0 sm:$0xff] }
0x139d   :  { %v1519_v10 = vpop.f32.mrb[26].mxu1 }
0x139e   :  { %v2383_v11 = vpop.f32.mrb[27].mxu1  ;;  %2457 = vrot.lane.b32.xlu1 %v2456_v8, %s2588_s30 }
0x1410   :  { %v2458_v12 = vpop.permute.xlu1 %2457 }
0x1411   :  { %v2460_v13 = vunpack.i.h.bf16 %v2458_v12  ;;  %v2459_v39 = vunpack.i.l.bf16 %v2458_v12 }
0x1413   :  { %v1531_v14 = vsel %vm181_vm2, %v2997_v22, %v2460_v13  ;;  %v1530_v16 = vsel %vm181_vm2, %v2995_v18, %v2459_v39 }
0x1414   :  { %v1537_v17 = vpack.c.bf16 %v1531_v14, %v1530_v16 }
0x1416   :  { %2389 = vmatmul.mubr.msk.bf16.vlgmr.msra.gmra.mrb[56].mxu0 %vm64_vm0, %v1537_v17 }
0x1417   :  { %2416 = vmatprep.mubr.msk.bf16.mxu0 %vm2582_vm1, %v2581_v15  ;;  %2401 = vmatpush3.bf16.msra.mxu0 %v2481_v38 }
0x1418   :  { %2402 = vmatprep.subr.bf16.mxu0 %v2581_v15 }
0x141b   :  { %2403 = vmatpush3.bf16.msra.mxu0 %v2482_v61 }
0x141c   :  { %2404 = vmatprep.subr.bf16.mxu0 %v2581_v15 }
0x141f   :  { %2405 = vmatpush3.bf16.msra.mxu0 %v2483_v62  ;;  %v2494_v62 = vld [vmem:[%s3187_s15 + $0x28] sm:$0xff]  }
0x1420   :  { %2406 = vmatprep.subr.bf16.mxu0 %v2581_v15 }
0x1423   :  { %2407 = vmatpush3.bf16.msra.mxu0 %v2484_v63  ;;  %v1979_v63 = vsel %vm64_vm0, %v2494_v62, 0 }
0x1424   :  { %2408 = vmatprep.subr.bf16.mxu0 %v2581_v15 }
0x1427   :  { %2409 = vmatpush3.bf16.msra.mxu0 %v2485_v31  ;;  %v2495_v31 = vld [vmem:[%s3187_s15 + $0x30] sm:$0xff]  }
0x1428   :  { %2410 = vmatprep.subr.bf16.mxu0 %v2581_v15 }
0x142b   :  { %2411 = vmatpush3.bf16.msra.mxu0 %v2486_v43  ;;  %v1982_v43 = vsel %vm64_vm0, %v2495_v31, 0 }
0x142c   :  { %2412 = vmatprep.subr.bf16.mxu0 %v2581_v15 }
0x142f   :  { %2413 = vmatpush3.bf16.msra.mxu0 %v2487_v2  ;;  %v2496_v2 = vld [vmem:[%s3187_s15 + $0x38] sm:$0xff]  }
0x1430   :  { %2414 = vmatprep.subr.bf16.mxu0 %v2581_v15 }
0x1433   :  { %2415 = vmatpush3.bf16.msra.mxu0 %v2488_v3  ;;  %v1985_v3 = vsel %vm64_vm0, %v2496_v2, 0 }
0x14e9   :  { %v1587_v19 = vpop.f32.mrb[56].mxu0 }
0x14ea   :  { %v1594_v21 = vadd.f32 %v1587_v19, %v2902_v53  ;;  %v2390_v23 = vpop.f32.mrb[57].mxu0 }
0x14eb   :  { %v1590_v24 = vpop.f32.mrb[58].mxu0 }
0x14ec   :  { %v3041_v25 = vadd.f32 %v2108_v20, %v1594_v21  ;;  %v1595_v22 = vadd.f32 %v1590_v24, %v2905_v56  ;;  %v2391_v18 = vpop.f32.mrb[59].mxu0 }
0x14ee   :  { %v3044_v26 = vadd.f32 %v2108_v20, %v1595_v22  ;;  %v1610_v27 = vsel %vm64_vm0, %v3041_v25, 0.0 }
0x14ef   :  { %1611 = vadd.xlane.f32.xlu1 %v1610_v27 }
0x14f0   :  { %v1613_v29 = vsel %vm64_vm0, %v3044_v26, 0.0 }
0x14f1   :  { %1614 = vadd.xlane.f32.xlu0 %v1613_v29 }
0x157c   :  { %v1612_v30 = vpop.xlane.xlu1 %1611 }
0x157d   :  { %v1616_v32 = vmul.f32 0.03125, %v1612_v30 }
0x157e   :  { %v1615_v53 = vpop.xlane.xlu0 %1614 }
0x157f   :  { %v1618_v33 = vsub.f32 %v3041_v25, %v1616_v32  ;;  %v1617_v34 = vmul.f32 0.03125, %v1615_v53 }
0x1581   :  { %v1619_v35 = vsub.f32 %v3044_v26, %v1617_v34  ;;  %v1620_v56 = vmul.f32 %v1618_v33, %v1618_v33 }
0x1583   :  { %v1622_v36 = vsel %vm64_vm0, %v1620_v56, 0.0  ;;  %v1621_v37 = vmul.f32 %v1619_v35, %v1619_v35 }
0x1584   :  { %1623 = vadd.xlane.f32.xlu0 %v1622_v36 }
0x1585   :  { %v1625_v41 = vsel %vm64_vm0, %v1621_v37, 0.0 }
0x1586   :  { %1626 = vadd.xlane.f32.xlu1 %v1625_v41 }
0x1611   :  { %v1624_v45 = vpop.xlane.xlu0 %1623 }
0x1612   :  { %v1628_v46 = vmul.f32 0.03125, %v1624_v45 }
0x1613   :  { %v1627_v47 = vpop.xlane.xlu1 %1626 }
0x1614   :  { %v1630_v0 = vadd.f32 1e-05, %v1628_v46  ;;  %v1629_v48 = vmul.f32 0.03125, %v1627_v47  ;;  %v2489_v46 = vld [vmem:[%s3187_s15] sm:$0xff]  }
0x1615   :  { %v1964_v47 = vsel %vm64_vm0, %v2489_v46, 0 }
0x1616   :  { %2545 = vrsqrt.f32 %v1630_v0  ;;  %v1631_v49 = vadd.f32 1e-05, %v1629_v48  ;;  %v2491_v0 = vld [vmem:[%s3187_s15 + $0x10] sm:$0xff]  }
0x1617   :  { %v1970_v48 = vsel %vm64_vm0, %v2491_v0, 0 }
0x1618   :  { %2547 = vrsqrt.f32 %v1631_v49  ;;  %v2492_v49 = vld [vmem:[%s3187_s15 + $0x18] sm:$0xff]  }
0x1620   :  { %v2546_v50 = vpop.eup %2545 }
0x1621   :  { %v1634_v51 = vmul.f32 %v2546_v50, %v1618_v33  ;;  %v2147_v33 = vld [vmem:[%s3184_s12 + $0x1] ss:$0 sm:$0xff]  ;;  %v1973_v50 = vsel %vm64_vm0, %v2492_v49, 0 }
0x1622   :  { %v2548_v52 = vpop.eup %2547 }
0x1623   :  { %v1642_v54 = vmul.f32 %v2111_v1, %v1634_v51  ;;  %v1635_v55 = vmul.f32 %v2548_v52, %v1619_v35 }
0x1625   :  { %v1643_v57 = vmul.f32 %v2111_v1, %v1635_v55  ;;  %v1650_v58 = vadd.f32 %v2112_v28, %v1642_v54  ;;  %v2493_v1 = vld [vmem:[%s3187_s15 + $0x20] sm:$0xff]  }
0x1626   :  { %v1976_v51 = vsel %vm64_vm0, %v2493_v1, 0 }
0x1627   :  { %v1651_v59 = vadd.f32 %v2112_v28, %v1643_v57 }
0x1629   :  { %v1657_v60 = vpack.c.bf16 %v1651_v59, %v1650_v58 }
0x162b   :  { %2397 = vmatmul.mubr.msk.bf16.vlgmr.msra.gmra.mrb[28].mxu1 %vm64_vm0, %v1657_v60 }
0x162c   :  { %2436 = vmatprep.mubr.msk.bf16.mxu1 %vm2582_vm1, %v2581_v15  ;;  %2421 = vmatpush3.bf16.xpose.msra.mxu1 %v1964_v47 }
0x162d   :  { %2422 = vmatprep.subr.bf16.mxu1 %v2581_v15 }
0x16fe   :  { %v1715_v5 = vpop.f32.mrb[28].mxu1 }
0x16ff   :  { %v1716_v42 = vadd.f32 %v2118_v4, %v1715_v5  ;;  %v2398_v6 = vpop.f32.mrb[29].mxu1 }
0x1700   :  { %v1718_v7 = vpop.f32.mrb[30].mxu1 }
0x1701   :  { %v1724_v8 = vmul.f32 %v1716_v42, %v1716_v42  ;;  %v1719_v9 = vadd.f32 %v2118_v4, %v1718_v7  ;;  %v2399_v10 = vpop.f32.mrb[31].mxu1  ;;  %v1722_v22 = vmul.f32 0.5, %v1716_v42 }
0x1703   :  { %v1726_v11 = vmul.f32 %v1724_v8, %v1716_v42  ;;  %v1725_v12 = vmul.f32 %v1719_v9, %v1719_v9  ;;  %v1723_v18 = vmul.f32 0.5, %v1719_v9 }
0x1705   :  { %v1728_v13 = vmul.f32 0.044715, %v1726_v11  ;;  %v1727_v39 = vmul.f32 %v1725_v12, %v1719_v9 }
0x1707   :  { %v1730_v14 = vadd.f32 %v1728_v13, %v1716_v42  ;;  %v1729_v16 = vmul.f32 0.044715, %v1727_v39  ;;  %v2149_v39 = vld [vmem:[%s3186_s14] ss:$0 sm:$0xff] }
0x1709   :  { %v1732_v17 = vmul.f32 0.7978846, %v1730_v14  ;;  %v1731_v19 = vadd.f32 %v1729_v16, %v1719_v9 }
0x170b   :  { %2549 = vtanh.f32 %v1732_v17  ;;  %v1733_v20 = vmul.f32 0.7978846, %v1731_v19 }
0x170d   :  { %2551 = vtanh.f32 %v1733_v20 }
0x1715   :  { %v2550_v21 = vpop.eup %2549 }
0x1716   :  { %v1736_v23 = vadd.f32 1.0, %v2550_v21 }
0x1717   :  { %v2552_v24 = vpop.eup %2551 }
0x1718   :  { %v1737_v27 = vadd.f32 1.0, %v2552_v24  ;;  %v1738_v29 = vmul.f32 %v1736_v23, %v1722_v22 }
0x171a   :  { %v1739_v30 = vmul.f32 %v1737_v27, %v1723_v18 }
0x171c   :  { %v1757_v32 = vpack.c.bf16 %v1739_v30, %v1738_v29 }
0x171e   :  { %2417 = vmatmul.mubr.bf16.vlgmr.msra.gmra.mrb[60].mxu0 %v1757_v32 }
0x17f1   :  { %v1840_v53 = vpop.f32.mrb[60].mxu0 }
0x17f2   :  { %v1847_v34 = vadd.f32 %v1840_v53, %v3041_v25  ;;  %v2418_v35 = vpop.f32.mrb[61].mxu0  ;;  %v2490_v25 = vld [vmem:[%s3187_s15 + $0x8] sm:$0xff]  }
0x17f3   :  { %v1843_v56 = vpop.f32.mrb[62].mxu0 }
0x17f4   :  { %v1848_v36 = vadd.f32 %v1843_v56, %v3044_v26  ;;  %v2419_v37 = vpop.f32.mrb[63].mxu0  ;;  %v1857_v41 = vadd.f32 %v2147_v33, %v1847_v34  ;;  %v1967_v26 = vsel %vm64_vm0, %v2490_v25, 0 }
0x17f5   :  { %2423 = vmatpush3.bf16.xpose.msra.mxu1 %v1967_v26 }
0x17f6   :  { %v1861_v40 = vsel %vm64_vm0, %v1857_v41, 0.0  ;;  %v1858_v44 = vadd.f32 %v2147_v33, %v1848_v36  ;;  %2424 = vmatprep.subr.bf16.mxu1 %v2581_v15 }
0x17f7   :  { %1862 = vadd.xlane.f32.xlu0 %v1861_v40 }
0x17f8   :  { %v1864_v45 = vsel %vm64_vm0, %v1858_v44, 0.0 }
0x17f9   :  { %1865 = vadd.xlane.f32.xlu1 %v1864_v45 }
0x17fd   :  { %2425 = vmatpush3.bf16.xpose.msra.mxu1 %v1970_v48 }
0x17fe   :  { %2426 = vmatprep.subr.bf16.mxu1 %v2581_v15 }
0x1805   :  { %2427 = vmatpush3.bf16.xpose.msra.mxu1 %v1973_v50 }
0x1806   :  { %2428 = vmatprep.subr.bf16.mxu1 %v2581_v15 }
0x180d   :  { %2429 = vmatpush3.bf16.xpose.msra.mxu1 %v1976_v51 }
0x180e   :  { %2430 = vmatprep.subr.bf16.mxu1 %v2581_v15 }
0x1815   :  { %2431 = vmatpush3.bf16.xpose.msra.mxu1 %v1979_v63 }
0x1816   :  { %2432 = vmatprep.subr.bf16.mxu1 %v2581_v15 }
0x181d   :  { %2433 = vmatpush3.bf16.xpose.msra.mxu1 %v1982_v43 }
0x181e   :  { %2434 = vmatprep.subr.bf16.mxu1 %v2581_v15  ;;  %v2148_v15 = vld [vmem:[%s3185_s13] ss:$0 sm:$0xff]  ;;  %s2557_s13 = scalar_lea.vmem %s2036_s21, 256 }
0x181f   :  { %p2558_p0 = scmp.ne.s32.totalorder %s2036_s21, %s2557_s13  ;;  %p2563_p2 = scmp.lt.s32.totalorder %s2557_s13, %s2557_s13 }
0x1821   :  { %p2564_p3 = por %p2563_p2, %p2562_p1 }
0x1823   :  { %p2565_p4 = pnand %p2564_p3, %p2558_p0 }
0x1825   :  { %2435 = vmatpush3.bf16.xpose.msra.mxu1 %v1985_v3 }
0x1884   :  { %v1863_v52 = vpop.xlane.xlu0 %1862 }
0x1885   :  { %v1867_v54 = vmul.f32 0.03125, %v1863_v52 }
0x1886   :  { %v1866_v55 = vpop.xlane.xlu1 %1865 }
0x1887   :  { %v1869_v28 = vsub.f32 %v1857_v41, %v1867_v54  ;;  %v1868_v57 = vmul.f32 0.03125, %v1866_v55 }
0x1889   :  { %v1870_v58 = vsub.f32 %v1858_v44, %v1868_v57  ;;  %v1871_v59 = vmul.f32 %v1869_v28, %v1869_v28 }
0x188b   :  { %v1873_v60 = vsel %vm64_vm0, %v1871_v59, 0.0  ;;  %v1872_v38 = vmul.f32 %v1870_v58, %v1870_v58 }
0x188c   :  { %1874 = vadd.xlane.f32.xlu0 %v1873_v60 }
0x188d   :  { %v1876_v61 = vsel %vm64_vm0, %v1872_v38, 0.0 }
0x188e   :  { %1877 = vadd.xlane.f32.xlu1 %v1876_v61 }
0x1919   :  { %v1875_v4 = vpop.xlane.xlu0 %1874 }
0x191a   :  { %v1879_v5 = vmul.f32 0.03125, %v1875_v4 }
0x191b   :  { %v1878_v42 = vpop.xlane.xlu1 %1877 }
0x191c   :  { %v1881_v6 = vadd.f32 1e-05, %v1879_v5  ;;  %v1880_v7 = vmul.f32 0.03125, %v1878_v42 }
0x191e   :  { %2553 = vrsqrt.f32 %v1881_v6  ;;  %v1882_v8 = vadd.f32 1e-05, %v1880_v7 }
0x1920   :  { %2555 = vrsqrt.f32 %v1882_v8 }
0x1928   :  { %v2554_v9 = vpop.eup %2553 }
0x1929   :  { %v1885_v10 = vmul.f32 %v2554_v9, %v1869_v28 }
0x192a   :  { %v2556_v11 = vpop.eup %2555 }
0x192b   :  { %v1893_v12 = vmul.f32 %v2148_v15, %v1885_v10  ;;  %v1886_v13 = vmul.f32 %v2556_v11, %v1870_v58 }
0x192d   :  { %v1894_v14 = vmul.f32 %v2148_v15, %v1886_v13  ;;  %v1901_v16 = vadd.f32 %v2149_v39, %v1893_v12 }
0x192f   :  { %v1902_v17 = vadd.f32 %v2149_v39, %v1894_v14 }
0x1931   :  { %v1903_v19 = vpack.c.bf16 %v1902_v17, %v1901_v16 }
0x1933   :  { %2437 = vmatmul.mubr.msk.bf16.vlgmr.msra.gmra.mrb[32].mxu1 %vm64_vm0, %v1903_v19 }
0x1a06   :  { %v2021_v20 = vpop.f32.mrb[32].mxu1 }
0x1a07   :  { %2028 = vst [vmem:[#allocation2] sm:$0xff] %v2021_v20  ;;  %v2438_v21 = vpop.f32.mrb[33].mxu1 }
0x1a08   :  { %v2024_v23 = vpop.f32.mrb[34].mxu1 }
0x1a09   :  { %2029 = vst [vmem:[#allocation2 + $0x8] sm:$0xff] %v2024_v23  ;;  %v2439_v24 = vpop.f32.mrb[35].mxu1 }
0x1a0a   :  { %2568 = shalt.err (!%p2565_p4)
}
0x1a0b   :  { %s2569_s22 = scalar_lea.hbm %s3188_s16, 256 }
0x1a0c   :  { %p2570_p5 = scmp.ne.s32.totalorder %s3188_s16, %s2569_s22  ;;  %p2573_p6 = scmp.lt.u32.totalorder %s2569_s22, %s3188_s16 }
0x1a0e   :  { %p2575_p7 = pnand %p2573_p6, %p2570_p5 }
0x1a10   :  { %2578 = shalt.err (!%p2575_p7)
}
0x1a11   :  { %s2590_s24 = smov 128   ;;  %s2591_s25 = smov 8  }
0x1a12   :  { %2041 = dma.vmem_to_hbm [thread:$0]  %s2036_s21, 256, %s3188_s16, [#allocation3], %s2590_s24, %s2590_s24, %s2591_s25  }
0x1a13   :  { %2579 = dma.done.wait [#allocation3], 256  }
0x1a14   :  { %2580 = vsyncadd [#allocation3], 4294967040 }
0x1a15   :  { %2045 = vsyncpa [#allocation3], 1 }

</bundles_post_ra>
